<compile_context>
chip_gen: v5e
topology: v5e:2x2
jax: 0.10.0
libtpu: 0.0.40
codegen_flags: <defaults>
</compile_context>

<pallas_src>
import functools

import jax
import jax.numpy as jnp
from jax.experimental import pallas as pl
from jax.experimental.pallas import tpu as pltpu


def _lstm_fc_kernel(x_ref,                       # (T*B, I)   time-major flattened input
                    w0_ih_ref, w0_hh_ref, b0_ref,    # (I,4H), (H,4H), (1,4H)
                    w1_ih_ref, w1_hh_ref, b1_ref,    # (H,4H), (H,4H), (1,4H)
                    fcw_ref, fcb_ref,                # (H,O), (1,O)
                    out_ref):                        # (B, O)
    B = out_ref.shape[0]
    H = w0_hh_ref.shape[0]
    T = x_ref.shape[0] // B

    # Recurrent (hidden->gates) weights, loaded once into vregs.
    w0_hh = w0_hh_ref[...]
    w1_hh = w1_hh_ref[...]

    def cell(pre_in, h, c, w_hh):
        # One fused-gate matmul per cell step; pre_in already contains x@W_ih + bias.
        pre = pre_in + jnp.dot(h, w_hh, preferred_element_type=jnp.float32)  # (B, 4H)
        sig = jax.nn.sigmoid(pre)     # one EUP pass over the whole fused gate vreg
        tnh = jnp.tanh(pre)           # one EUP pass
        i = sig[:, 0 * H:1 * H]
        f = sig[:, 1 * H:2 * H]
        g = tnh[:, 2 * H:3 * H]
        o = sig[:, 3 * H:4 * H]
        c_new = f * c + i * g
        h_new = o * jnp.tanh(c_new)
        return h_new, c_new

    zeros = jnp.zeros((B, H), jnp.float32)

    # -------- Layer 0 --------
    # Whole-sequence input projection in a single MXU pass; bias folded in here so
    # the recurrence body is matmul + vadd only (no per-step broadcast_in_dim).
    gates0_all = (jnp.dot(x_ref[...], w0_ih_ref[...],
                          preferred_element_type=jnp.float32)
                  + b0_ref[...])                              # (T*B, 4H)

    h0, c0 = zeros, zeros
    h0_seq = []
    for t in range(T):                                        # fully unrolled (T small, static)
        h0, c0 = cell(gates0_all[t * B:(t + 1) * B, :], h0, c0, w0_hh)
        h0_seq.append(h0)
    h0_all = jnp.concatenate(h0_seq, axis=0)                  # (T*B, H), time-major

    # -------- Layer 1 --------
    gates1_all = (jnp.dot(h0_all, w1_ih_ref[...],
                          preferred_element_type=jnp.float32)
                  + b1_ref[...])                              # (T*B, 4H)

    h1, c1 = zeros, zeros
    for t in range(T):                                        # fully unrolled
        h1, c1 = cell(gates1_all[t * B:(t + 1) * B, :], h1, c1, w1_hh)

    # Final Linear on the last timestep's layer-1 hidden state.
    out = jnp.dot(h1, fcw_ref[...], preferred_element_type=jnp.float32) + fcb_ref[...]
    out_ref[...] = out.astype(out_ref.dtype)


def prepare_params(w0_ih, w0_hh, b0_ih, b0_hh,
                   w1_ih, w1_hh, b1_ih, b1_hh, fc_w, fc_b):
    """One-time re-layout of PyTorch-convention weights into MXU-friendly fused form.
       Inputs: w*_ih (4, H, in), w*_hh (4, H, H), b* (4, H), fc_w (O, H), fc_b (O,)."""
    def fuse_w(w):  # (4, H, in) -> (in, 4H), gate order [i,f,g,o] along lanes
        four, H, In = w.shape
        return jnp.transpose(w, (2, 0, 1)).reshape(In, four * H).astype(jnp.float32)

    def fuse_b(b_ih, b_hh):  # (4, H)+(4, H) -> (1, 4H)
        return (b_ih + b_hh).reshape(1, -1).astype(jnp.float32)

    return (fuse_w(w0_ih), fuse_w(w0_hh), fuse_b(b0_ih, b0_hh),
            fuse_w(w1_ih), fuse_w(w1_hh), fuse_b(b1_ih, b1_hh),
            fc_w.T.astype(jnp.float32), fc_b[None, :].astype(jnp.float32))


@jax.jit
def jet_position_lstm(x, params):
    """x: (batch, seq, input) float32; params: output of prepare_params()."""
    (w0_ih_f, w0_hh_f, b0_f, w1_ih_f, w1_hh_f, b1_f, fcw_t, fcb) = params
    B, T, I = x.shape
    H = w0_hh_f.shape[0]
    O = fcw_t.shape[1]

    # Only per-call layout work: flatten x to time-major (T*B, I) (48 floats, fused
    # into the jitted program).
    x_tm = jnp.transpose(x, (1, 0, 2)).reshape(T * B, I).astype(jnp.float32)

    vmem = pl.BlockSpec(memory_space=pltpu.MemorySpace.VMEM)
    return pl.pallas_call(
        _lstm_fc_kernel,
        out_shape=jax.ShapeDtypeStruct((B, O), jnp.float32),
        in_specs=[vmem] * 9,
        out_specs=vmem,
    )(x_tm, w0_ih_f, w0_hh_f, b0_f, w1_ih_f, w1_hh_f, b1_f, fcw_t, fcb)


def _reference(x, w0_ih, w0_hh, b0_ih, b0_hh, w1_ih, w1_hh, b1_ih, b1_hh, fc_w, fc_b):
    """Pure-JAX reference of the same (eval-mode) math, for correctness checking."""
    B, T, I = x.shape
    H = w0_hh.shape[1]

    def cell(x_t, h, c, wih, whh, bih, bhh):
        gates = [x_t @ wih[g].T + h @ whh[g].T + bih[g] + bhh[g] for g in range(4)]
        i = jax.nn.sigmoid(gates[0]); f = jax.nn.sigmoid(gates[1])
        g_ = jnp.tanh(gates[2]);      o = jax.nn.sigmoid(gates[3])
        c = f * c + i * g_
        return o * jnp.tanh(c), c

    h0 = c0 = h1 = c1 = jnp.zeros((B, H), jnp.float32)
    for t in range(T):
        h0, c0 = cell(x[:, t, :], h0, c0, w0_ih, w0_hh, b0_ih, b0_hh)
        h1, c1 = cell(h0, h1, c1, w1_ih, w1_hh, b1_ih, b1_hh)
    return h1 @ fc_w.T + fc_b


if __name__ == "__main__":
    # Module defaults: input_size=3, hidden_size=10, num_layers=2, output_size=3.
    B, T, I, H, O = 2, 8, 3, 10, 3

    key = jax.random.PRNGKey(0)
    keys = jax.random.split(key, 12)
    k = 1.0 / jnp.sqrt(jnp.float32(H))

    def u(kk, shape):
        return jax.random.uniform(kk, shape, jnp.float32, -k, k)

    # LSTM layer 0 (PyTorch shapes, gate order [i, f, g, o] along the leading 4-axis).
    w0_ih = u(keys[0], (4, H, I)); w0_hh = u(keys[1], (4, H, H))
    b0_ih = u(keys[2], (4, H));    b0_hh = u(keys[3], (4, H))
    # LSTM layer 1.
    w1_ih = u(keys[4], (4, H, H)); w1_hh = u(keys[5], (4, H, H))
    b1_ih = u(keys[6], (4, H));    b1_hh = u(keys[7], (4, H))
    # Final Linear(hidden -> output).
    fc_w = jax.random.uniform(keys[8], (O, H), jnp.float32, -k, k)
    fc_b = jax.random.uniform(keys[9], (O,),   jnp.float32, -k, k)

    x = jax.random.normal(keys[10], (B, T, I), jnp.float32)

    # One-time parameter re-layout (not on the per-call path).
    params = jax.tree_util.tree_map(jax.block_until_ready,
                                    prepare_params(w0_ih, w0_hh, b0_ih, b0_hh,
                                                   w1_ih, w1_hh, b1_ih, b1_hh,
                                                   fc_w, fc_b))

    out = jet_position_lstm(x, params)
    out = jax.block_until_ready(out)

    ref = _reference(x, w0_ih, w0_hh, b0_ih, b0_hh,
                     w1_ih, w1_hh, b1_ih, b1_hh, fc_w, fc_b)

    assert out.shape == (B, O), out.shape
    assert jnp.allclose(out, ref, rtol=1e-5, atol=1e-5), (out, ref)
    print("KERNEL_OK")
</pallas_src>

<mosaic_0001>
module attributes {stable_mosaic.version = 11 : i64} {
  func.func @_lstm_fc_kernel(%arg0: memref<16x3xf32, #tpu.memory_space<vmem>>, %arg1: memref<3x40xf32, #tpu.memory_space<vmem>>, %arg2: memref<10x40xf32, #tpu.memory_space<vmem>>, %arg3: memref<1x40xf32, #tpu.memory_space<vmem>>, %arg4: memref<10x40xf32, #tpu.memory_space<vmem>>, %arg5: memref<10x40xf32, #tpu.memory_space<vmem>>, %arg6: memref<1x40xf32, #tpu.memory_space<vmem>>, %arg7: memref<10x3xf32, #tpu.memory_space<vmem>>, %arg8: memref<1x3xf32, #tpu.memory_space<vmem>>, %arg9: memref<2x3xf32, #tpu.memory_space<vmem>>) attributes {dimension_semantics = [], scalar_prefetch = 0 : i64, scratch_operands = 0 : i64, tpu.core_type = #tpu.core_type<tc>} {
    %c0 = arith.constant 0 : index
    %c0_0 = arith.constant 0 : index
    %0 = vector.load %arg2[%c0, %c0_0] : memref<10x40xf32, #tpu.memory_space<vmem>>, vector<10x40xf32>
    %c0_1 = arith.constant 0 : index
    %c0_2 = arith.constant 0 : index
    %1 = vector.load %arg5[%c0_1, %c0_2] : memref<10x40xf32, #tpu.memory_space<vmem>>, vector<10x40xf32>
    %cst = arith.constant 0.000000e+00 : f32
    %2 = vector.broadcast %cst : f32 to vector<2x10xf32>
    %c0_3 = arith.constant 0 : index
    %c0_4 = arith.constant 0 : index
    %3 = vector.load %arg0[%c0_3, %c0_4] : memref<16x3xf32, #tpu.memory_space<vmem>>, vector<16x3xf32>
    %c0_5 = arith.constant 0 : index
    %c0_6 = arith.constant 0 : index
    %4 = vector.load %arg1[%c0_5, %c0_6] : memref<3x40xf32, #tpu.memory_space<vmem>>, vector<3x40xf32>
    %cst_7 = arith.constant dense<0.000000e+00> : vector<16x40xf32>
    %5 = tpu.matmul %3, %4, %cst_7 {dimension_numbers = #tpu.dot_dimension_numbers<[1], [0], [0], [1], [0, 0, 1, 1], [], []>} : vector<16x3xf32>, vector<3x40xf32>, vector<16x40xf32> -> vector<16x40xf32>
    %c0_8 = arith.constant 0 : index
    %c0_9 = arith.constant 0 : index
    %6 = vector.load %arg3[%c0_8, %c0_9] : memref<1x40xf32, #tpu.memory_space<vmem>>, vector<1x40xf32>
    %7 = vector.broadcast %6 : vector<1x40xf32> to vector<16x40xf32>
    %8 = arith.addf %5, %7 : vector<16x40xf32>
    %9 = vector.extract_strided_slice %8 {offsets = [0, 0], sizes = [2, 40], strides = [1, 1]} : vector<16x40xf32> to vector<2x40xf32>
    %cst_10 = arith.constant dense<0.000000e+00> : vector<2x40xf32>
    %10 = tpu.matmul %2, %0, %cst_10 {dimension_numbers = #tpu.dot_dimension_numbers<[1], [0], [0], [1], [0, 0, 1, 1], [], []>} : vector<2x10xf32>, vector<10x40xf32>, vector<2x40xf32> -> vector<2x40xf32>
    %11 = arith.addf %9, %10 : vector<2x40xf32>
    %12 = arith.negf %11 : vector<2x40xf32>
    %13 = math.exp %12 : vector<2x40xf32>
    %cst_11 = arith.constant 1.000000e+00 : f32
    %14 = vector.broadcast %cst_11 : f32 to vector<2x40xf32>
    %15 = arith.addf %14, %13 : vector<2x40xf32>
    %16 = arith.divf %14, %15 : vector<2x40xf32>
    %17 = math.tanh %11 : vector<2x40xf32>
    %18 = vector.extract_strided_slice %16 {offsets = [0, 0], sizes = [2, 10], strides = [1, 1]} : vector<2x40xf32> to vector<2x10xf32>
    %19 = vector.extract_strided_slice %16 {offsets = [0, 10], sizes = [2, 10], strides = [1, 1]} : vector<2x40xf32> to vector<2x10xf32>
    %20 = vector.extract_strided_slice %17 {offsets = [0, 20], sizes = [2, 10], strides = [1, 1]} : vector<2x40xf32> to vector<2x10xf32>
    %21 = vector.extract_strided_slice %16 {offsets = [0, 30], sizes = [2, 10], strides = [1, 1]} : vector<2x40xf32> to vector<2x10xf32>
    %22 = arith.mulf %19, %2 : vector<2x10xf32>
    %23 = arith.mulf %18, %20 : vector<2x10xf32>
    %24 = arith.addf %22, %23 : vector<2x10xf32>
    %25 = math.tanh %24 : vector<2x10xf32>
    %26 = arith.mulf %21, %25 : vector<2x10xf32>
    %27 = vector.extract_strided_slice %8 {offsets = [2, 0], sizes = [2, 40], strides = [1, 1]} : vector<16x40xf32> to vector<2x40xf32>
    %cst_12 = arith.constant dense<0.000000e+00> : vector<2x40xf32>
    %28 = tpu.matmul %26, %0, %cst_12 {dimension_numbers = #tpu.dot_dimension_numbers<[1], [0], [0], [1], [0, 0, 1, 1], [], []>} : vector<2x10xf32>, vector<10x40xf32>, vector<2x40xf32> -> vector<2x40xf32>
    %29 = arith.addf %27, %28 : vector<2x40xf32>
    %30 = arith.negf %29 : vector<2x40xf32>
    %31 = math.exp %30 : vector<2x40xf32>
    %cst_13 = arith.constant 1.000000e+00 : f32
    %32 = vector.broadcast %cst_13 : f32 to vector<2x40xf32>
    %33 = arith.addf %32, %31 : vector<2x40xf32>
    %34 = arith.divf %32, %33 : vector<2x40xf32>
    %35 = math.tanh %29 : vector<2x40xf32>
    %36 = vector.extract_strided_slice %34 {offsets = [0, 0], sizes = [2, 10], strides = [1, 1]} : vector<2x40xf32> to vector<2x10xf32>
    %37 = vector.extract_strided_slice %34 {offsets = [0, 10], sizes = [2, 10], strides = [1, 1]} : vector<2x40xf32> to vector<2x10xf32>
    %38 = vector.extract_strided_slice %35 {offsets = [0, 20], sizes = [2, 10], strides = [1, 1]} : vector<2x40xf32> to vector<2x10xf32>
    %39 = vector.extract_strided_slice %34 {offsets = [0, 30], sizes = [2, 10], strides = [1, 1]} : vector<2x40xf32> to vector<2x10xf32>
    %40 = arith.mulf %37, %24 : vector<2x10xf32>
    %41 = arith.mulf %36, %38 : vector<2x10xf32>
    %42 = arith.addf %40, %41 : vector<2x10xf32>
    %43 = math.tanh %42 : vector<2x10xf32>
    %44 = arith.mulf %39, %43 : vector<2x10xf32>
    %45 = vector.extract_strided_slice %8 {offsets = [4, 0], sizes = [2, 40], strides = [1, 1]} : vector<16x40xf32> to vector<2x40xf32>
    %cst_14 = arith.constant dense<0.000000e+00> : vector<2x40xf32>
    %46 = tpu.matmul %44, %0, %cst_14 {dimension_numbers = #tpu.dot_dimension_numbers<[1], [0], [0], [1], [0, 0, 1, 1], [], []>} : vector<2x10xf32>, vector<10x40xf32>, vector<2x40xf32> -> vector<2x40xf32>
    %47 = arith.addf %45, %46 : vector<2x40xf32>
    %48 = arith.negf %47 : vector<2x40xf32>
    %49 = math.exp %48 : vector<2x40xf32>
    %cst_15 = arith.constant 1.000000e+00 : f32
    %50 = vector.broadcast %cst_15 : f32 to vector<2x40xf32>
    %51 = arith.addf %50, %49 : vector<2x40xf32>
    %52 = arith.divf %50, %51 : vector<2x40xf32>
    %53 = math.tanh %47 : vector<2x40xf32>
    %54 = vector.extract_strided_slice %52 {offsets = [0, 0], sizes = [2, 10], strides = [1, 1]} : vector<2x40xf32> to vector<2x10xf32>
    %55 = vector.extract_strided_slice %52 {offsets = [0, 10], sizes = [2, 10], strides = [1, 1]} : vector<2x40xf32> to vector<2x10xf32>
    %56 = vector.extract_strided_slice %53 {offsets = [0, 20], sizes = [2, 10], strides = [1, 1]} : vector<2x40xf32> to vector<2x10xf32>
    %57 = vector.extract_strided_slice %52 {offsets = [0, 30], sizes = [2, 10], strides = [1, 1]} : vector<2x40xf32> to vector<2x10xf32>
    %58 = arith.mulf %55, %42 : vector<2x10xf32>
    %59 = arith.mulf %54, %56 : vector<2x10xf32>
    %60 = arith.addf %58, %59 : vector<2x10xf32>
    %61 = math.tanh %60 : vector<2x10xf32>
    %62 = arith.mulf %57, %61 : vector<2x10xf32>
    %63 = vector.extract_strided_slice %8 {offsets = [6, 0], sizes = [2, 40], strides = [1, 1]} : vector<16x40xf32> to vector<2x40xf32>
    %cst_16 = arith.constant dense<0.000000e+00> : vector<2x40xf32>
    %64 = tpu.matmul %62, %0, %cst_16 {dimension_numbers = #tpu.dot_dimension_numbers<[1], [0], [0], [1], [0, 0, 1, 1], [], []>} : vector<2x10xf32>, vector<10x40xf32>, vector<2x40xf32> -> vector<2x40xf32>
    %65 = arith.addf %63, %64 : vector<2x40xf32>
    %66 = arith.negf %65 : vector<2x40xf32>
    %67 = math.exp %66 : vector<2x40xf32>
    %cst_17 = arith.constant 1.000000e+00 : f32
    %68 = vector.broadcast %cst_17 : f32 to vector<2x40xf32>
    %69 = arith.addf %68, %67 : vector<2x40xf32>
    %70 = arith.divf %68, %69 : vector<2x40xf32>
    %71 = math.tanh %65 : vector<2x40xf32>
    %72 = vector.extract_strided_slice %70 {offsets = [0, 0], sizes = [2, 10], strides = [1, 1]} : vector<2x40xf32> to vector<2x10xf32>
    %73 = vector.extract_strided_slice %70 {offsets = [0, 10], sizes = [2, 10], strides = [1, 1]} : vector<2x40xf32> to vector<2x10xf32>
    %74 = vector.extract_strided_slice %71 {offsets = [0, 20], sizes = [2, 10], strides = [1, 1]} : vector<2x40xf32> to vector<2x10xf32>
    %75 = vector.extract_strided_slice %70 {offsets = [0, 30], sizes = [2, 10], strides = [1, 1]} : vector<2x40xf32> to vector<2x10xf32>
    %76 = arith.mulf %73, %60 : vector<2x10xf32>
    %77 = arith.mulf %72, %74 : vector<2x10xf32>
    %78 = arith.addf %76, %77 : vector<2x10xf32>
    %79 = math.tanh %78 : vector<2x10xf32>
    %80 = arith.mulf %75, %79 : vector<2x10xf32>
    %81 = vector.extract_strided_slice %8 {offsets = [8, 0], sizes = [2, 40], strides = [1, 1]} : vector<16x40xf32> to vector<2x40xf32>
    %cst_18 = arith.constant dense<0.000000e+00> : vector<2x40xf32>
    %82 = tpu.matmul %80, %0, %cst_18 {dimension_numbers = #tpu.dot_dimension_numbers<[1], [0], [0], [1], [0, 0, 1, 1], [], []>} : vector<2x10xf32>, vector<10x40xf32>, vector<2x40xf32> -> vector<2x40xf32>
    %83 = arith.addf %81, %82 : vector<2x40xf32>
    %84 = arith.negf %83 : vector<2x40xf32>
    %85 = math.exp %84 : vector<2x40xf32>
    %cst_19 = arith.constant 1.000000e+00 : f32
    %86 = vector.broadcast %cst_19 : f32 to vector<2x40xf32>
    %87 = arith.addf %86, %85 : vector<2x40xf32>
    %88 = arith.divf %86, %87 : vector<2x40xf32>
    %89 = math.tanh %83 : vector<2x40xf32>
    %90 = vector.extract_strided_slice %88 {offsets = [0, 0], sizes = [2, 10], strides = [1, 1]} : vector<2x40xf32> to vector<2x10xf32>
    %91 = vector.extract_strided_slice %88 {offsets = [0, 10], sizes = [2, 10], strides = [1, 1]} : vector<2x40xf32> to vector<2x10xf32>
    %92 = vector.extract_strided_slice %89 {offsets = [0, 20], sizes = [2, 10], strides = [1, 1]} : vector<2x40xf32> to vector<2x10xf32>
    %93 = vector.extract_strided_slice %88 {offsets = [0, 30], sizes = [2, 10], strides = [1, 1]} : vector<2x40xf32> to vector<2x10xf32>
    %94 = arith.mulf %91, %78 : vector<2x10xf32>
    %95 = arith.mulf %90, %92 : vector<2x10xf32>
    %96 = arith.addf %94, %95 : vector<2x10xf32>
    %97 = math.tanh %96 : vector<2x10xf32>
    %98 = arith.mulf %93, %97 : vector<2x10xf32>
    %99 = vector.extract_strided_slice %8 {offsets = [10, 0], sizes = [2, 40], strides = [1, 1]} : vector<16x40xf32> to vector<2x40xf32>
    %cst_20 = arith.constant dense<0.000000e+00> : vector<2x40xf32>
    %100 = tpu.matmul %98, %0, %cst_20 {dimension_numbers = #tpu.dot_dimension_numbers<[1], [0], [0], [1], [0, 0, 1, 1], [], []>} : vector<2x10xf32>, vector<10x40xf32>, vector<2x40xf32> -> vector<2x40xf32>
    %101 = arith.addf %99, %100 : vector<2x40xf32>
    %102 = arith.negf %101 : vector<2x40xf32>
    %103 = math.exp %102 : vector<2x40xf32>
    %cst_21 = arith.constant 1.000000e+00 : f32
    %104 = vector.broadcast %cst_21 : f32 to vector<2x40xf32>
    %105 = arith.addf %104, %103 : vector<2x40xf32>
    %106 = arith.divf %104, %105 : vector<2x40xf32>
    %107 = math.tanh %101 : vector<2x40xf32>
    %108 = vector.extract_strided_slice %106 {offsets = [0, 0], sizes = [2, 10], strides = [1, 1]} : vector<2x40xf32> to vector<2x10xf32>
    %109 = vector.extract_strided_slice %106 {offsets = [0, 10], sizes = [2, 10], strides = [1, 1]} : vector<2x40xf32> to vector<2x10xf32>
    %110 = vector.extract_strided_slice %107 {offsets = [0, 20], sizes = [2, 10], strides = [1, 1]} : vector<2x40xf32> to vector<2x10xf32>
    %111 = vector.extract_strided_slice %106 {offsets = [0, 30], sizes = [2, 10], strides = [1, 1]} : vector<2x40xf32> to vector<2x10xf32>
    %112 = arith.mulf %109, %96 : vector<2x10xf32>
    %113 = arith.mulf %108, %110 : vector<2x10xf32>
    %114 = arith.addf %112, %113 : vector<2x10xf32>
    %115 = math.tanh %114 : vector<2x10xf32>
    %116 = arith.mulf %111, %115 : vector<2x10xf32>
    %117 = vector.extract_strided_slice %8 {offsets = [12, 0], sizes = [2, 40], strides = [1, 1]} : vector<16x40xf32> to vector<2x40xf32>
    %cst_22 = arith.constant dense<0.000000e+00> : vector<2x40xf32>
    %118 = tpu.matmul %116, %0, %cst_22 {dimension_numbers = #tpu.dot_dimension_numbers<[1], [0], [0], [1], [0, 0, 1, 1], [], []>} : vector<2x10xf32>, vector<10x40xf32>, vector<2x40xf32> -> vector<2x40xf32>
    %119 = arith.addf %117, %118 : vector<2x40xf32>
    %120 = arith.negf %119 : vector<2x40xf32>
    %121 = math.exp %120 : vector<2x40xf32>
    %cst_23 = arith.constant 1.000000e+00 : f32
    %122 = vector.broadcast %cst_23 : f32 to vector<2x40xf32>
    %123 = arith.addf %122, %121 : vector<2x40xf32>
    %124 = arith.divf %122, %123 : vector<2x40xf32>
    %125 = math.tanh %119 : vector<2x40xf32>
    %126 = vector.extract_strided_slice %124 {offsets = [0, 0], sizes = [2, 10], strides = [1, 1]} : vector<2x40xf32> to vector<2x10xf32>
    %127 = vector.extract_strided_slice %124 {offsets = [0, 10], sizes = [2, 10], strides = [1, 1]} : vector<2x40xf32> to vector<2x10xf32>
    %128 = vector.extract_strided_slice %125 {offsets = [0, 20], sizes = [2, 10], strides = [1, 1]} : vector<2x40xf32> to vector<2x10xf32>
    %129 = vector.extract_strided_slice %124 {offsets = [0, 30], sizes = [2, 10], strides = [1, 1]} : vector<2x40xf32> to vector<2x10xf32>
    %130 = arith.mulf %127, %114 : vector<2x10xf32>
    %131 = arith.mulf %126, %128 : vector<2x10xf32>
    %132 = arith.addf %130, %131 : vector<2x10xf32>
    %133 = math.tanh %132 : vector<2x10xf32>
    %134 = arith.mulf %129, %133 : vector<2x10xf32>
    %135 = vector.extract_strided_slice %8 {offsets = [14, 0], sizes = [2, 40], strides = [1, 1]} : vector<16x40xf32> to vector<2x40xf32>
    %cst_24 = arith.constant dense<0.000000e+00> : vector<2x40xf32>
    %136 = tpu.matmul %134, %0, %cst_24 {dimension_numbers = #tpu.dot_dimension_numbers<[1], [0], [0], [1], [0, 0, 1, 1], [], []>} : vector<2x10xf32>, vector<10x40xf32>, vector<2x40xf32> -> vector<2x40xf32>
    %137 = arith.addf %135, %136 : vector<2x40xf32>
    %138 = arith.negf %137 : vector<2x40xf32>
    %139 = math.exp %138 : vector<2x40xf32>
    %cst_25 = arith.constant 1.000000e+00 : f32
    %140 = vector.broadcast %cst_25 : f32 to vector<2x40xf32>
    %141 = arith.addf %140, %139 : vector<2x40xf32>
    %142 = arith.divf %140, %141 : vector<2x40xf32>
    %143 = math.tanh %137 : vector<2x40xf32>
    %144 = vector.extract_strided_slice %142 {offsets = [0, 0], sizes = [2, 10], strides = [1, 1]} : vector<2x40xf32> to vector<2x10xf32>
    %145 = vector.extract_strided_slice %142 {offsets = [0, 10], sizes = [2, 10], strides = [1, 1]} : vector<2x40xf32> to vector<2x10xf32>
    %146 = vector.extract_strided_slice %143 {offsets = [0, 20], sizes = [2, 10], strides = [1, 1]} : vector<2x40xf32> to vector<2x10xf32>
    %147 = vector.extract_strided_slice %142 {offsets = [0, 30], sizes = [2, 10], strides = [1, 1]} : vector<2x40xf32> to vector<2x10xf32>
    %148 = arith.mulf %145, %132 : vector<2x10xf32>
    %149 = arith.mulf %144, %146 : vector<2x10xf32>
    %150 = arith.addf %148, %149 : vector<2x10xf32>
    %151 = math.tanh %150 : vector<2x10xf32>
    %152 = arith.mulf %147, %151 : vector<2x10xf32>
    %153 = tpu.concatenate %26, %44, %62, %80, %98, %116, %134, %152 in 0 : vector<2x10xf32>, vector<2x10xf32>, vector<2x10xf32>, vector<2x10xf32>, vector<2x10xf32>, vector<2x10xf32>, vector<2x10xf32>, vector<2x10xf32> -> vector<16x10xf32>
    %c0_26 = arith.constant 0 : index
    %c0_27 = arith.constant 0 : index
    %154 = vector.load %arg4[%c0_26, %c0_27] : memref<10x40xf32, #tpu.memory_space<vmem>>, vector<10x40xf32>
    %cst_28 = arith.constant dense<0.000000e+00> : vector<16x40xf32>
    %155 = tpu.matmul %153, %154, %cst_28 {dimension_numbers = #tpu.dot_dimension_numbers<[1], [0], [0], [1], [0, 0, 1, 1], [], []>} : vector<16x10xf32>, vector<10x40xf32>, vector<16x40xf32> -> vector<16x40xf32>
    %c0_29 = arith.constant 0 : index
    %c0_30 = arith.constant 0 : index
    %156 = vector.load %arg6[%c0_29, %c0_30] : memref<1x40xf32, #tpu.memory_space<vmem>>, vector<1x40xf32>
    %157 = vector.broadcast %156 : vector<1x40xf32> to vector<16x40xf32>
    %158 = arith.addf %155, %157 : vector<16x40xf32>
    %159 = vector.extract_strided_slice %158 {offsets = [0, 0], sizes = [2, 40], strides = [1, 1]} : vector<16x40xf32> to vector<2x40xf32>
    %cst_31 = arith.constant dense<0.000000e+00> : vector<2x40xf32>
    %160 = tpu.matmul %2, %1, %cst_31 {dimension_numbers = #tpu.dot_dimension_numbers<[1], [0], [0], [1], [0, 0, 1, 1], [], []>} : vector<2x10xf32>, vector<10x40xf32>, vector<2x40xf32> -> vector<2x40xf32>
    %161 = arith.addf %159, %160 : vector<2x40xf32>
    %162 = arith.negf %161 : vector<2x40xf32>
    %163 = math.exp %162 : vector<2x40xf32>
    %cst_32 = arith.constant 1.000000e+00 : f32
    %164 = vector.broadcast %cst_32 : f32 to vector<2x40xf32>
    %165 = arith.addf %164, %163 : vector<2x40xf32>
    %166 = arith.divf %164, %165 : vector<2x40xf32>
    %167 = math.tanh %161 : vector<2x40xf32>
    %168 = vector.extract_strided_slice %166 {offsets = [0, 0], sizes = [2, 10], strides = [1, 1]} : vector<2x40xf32> to vector<2x10xf32>
    %169 = vector.extract_strided_slice %166 {offsets = [0, 10], sizes = [2, 10], strides = [1, 1]} : vector<2x40xf32> to vector<2x10xf32>
    %170 = vector.extract_strided_slice %167 {offsets = [0, 20], sizes = [2, 10], strides = [1, 1]} : vector<2x40xf32> to vector<2x10xf32>
    %171 = vector.extract_strided_slice %166 {offsets = [0, 30], sizes = [2, 10], strides = [1, 1]} : vector<2x40xf32> to vector<2x10xf32>
    %172 = arith.mulf %169, %2 : vector<2x10xf32>
    %173 = arith.mulf %168, %170 : vector<2x10xf32>
    %174 = arith.addf %172, %173 : vector<2x10xf32>
    %175 = math.tanh %174 : vector<2x10xf32>
    %176 = arith.mulf %171, %175 : vector<2x10xf32>
    %177 = vector.extract_strided_slice %158 {offsets = [2, 0], sizes = [2, 40], strides = [1, 1]} : vector<16x40xf32> to vector<2x40xf32>
    %cst_33 = arith.constant dense<0.000000e+00> : vector<2x40xf32>
    %178 = tpu.matmul %176, %1, %cst_33 {dimension_numbers = #tpu.dot_dimension_numbers<[1], [0], [0], [1], [0, 0, 1, 1], [], []>} : vector<2x10xf32>, vector<10x40xf32>, vector<2x40xf32> -> vector<2x40xf32>
    %179 = arith.addf %177, %178 : vector<2x40xf32>
    %180 = arith.negf %179 : vector<2x40xf32>
    %181 = math.exp %180 : vector<2x40xf32>
    %cst_34 = arith.constant 1.000000e+00 : f32
    %182 = vector.broadcast %cst_34 : f32 to vector<2x40xf32>
    %183 = arith.addf %182, %181 : vector<2x40xf32>
    %184 = arith.divf %182, %183 : vector<2x40xf32>
    %185 = math.tanh %179 : vector<2x40xf32>
    %186 = vector.extract_strided_slice %184 {offsets = [0, 0], sizes = [2, 10], strides = [1, 1]} : vector<2x40xf32> to vector<2x10xf32>
    %187 = vector.extract_strided_slice %184 {offsets = [0, 10], sizes = [2, 10], strides = [1, 1]} : vector<2x40xf32> to vector<2x10xf32>
    %188 = vector.extract_strided_slice %185 {offsets = [0, 20], sizes = [2, 10], strides = [1, 1]} : vector<2x40xf32> to vector<2x10xf32>
    %189 = vector.extract_strided_slice %184 {offsets = [0, 30], sizes = [2, 10], strides = [1, 1]} : vector<2x40xf32> to vector<2x10xf32>
    %190 = arith.mulf %187, %174 : vector<2x10xf32>
    %191 = arith.mulf %186, %188 : vector<2x10xf32>
    %192 = arith.addf %190, %191 : vector<2x10xf32>
    %193 = math.tanh %192 : vector<2x10xf32>
    %194 = arith.mulf %189, %193 : vector<2x10xf32>
    %195 = vector.extract_strided_slice %158 {offsets = [4, 0], sizes = [2, 40], strides = [1, 1]} : vector<16x40xf32> to vector<2x40xf32>
    %cst_35 = arith.constant dense<0.000000e+00> : vector<2x40xf32>
    %196 = tpu.matmul %194, %1, %cst_35 {dimension_numbers = #tpu.dot_dimension_numbers<[1], [0], [0], [1], [0, 0, 1, 1], [], []>} : vector<2x10xf32>, vector<10x40xf32>, vector<2x40xf32> -> vector<2x40xf32>
    %197 = arith.addf %195, %196 : vector<2x40xf32>
    %198 = arith.negf %197 : vector<2x40xf32>
    %199 = math.exp %198 : vector<2x40xf32>
    %cst_36 = arith.constant 1.000000e+00 : f32
    %200 = vector.broadcast %cst_36 : f32 to vector<2x40xf32>
    %201 = arith.addf %200, %199 : vector<2x40xf32>
    %202 = arith.divf %200, %201 : vector<2x40xf32>
    %203 = math.tanh %197 : vector<2x40xf32>
    %204 = vector.extract_strided_slice %202 {offsets = [0, 0], sizes = [2, 10], strides = [1, 1]} : vector<2x40xf32> to vector<2x10xf32>
    %205 = vector.extract_strided_slice %202 {offsets = [0, 10], sizes = [2, 10], strides = [1, 1]} : vector<2x40xf32> to vector<2x10xf32>
    %206 = vector.extract_strided_slice %203 {offsets = [0, 20], sizes = [2, 10], strides = [1, 1]} : vector<2x40xf32> to vector<2x10xf32>
    %207 = vector.extract_strided_slice %202 {offsets = [0, 30], sizes = [2, 10], strides = [1, 1]} : vector<2x40xf32> to vector<2x10xf32>
    %208 = arith.mulf %205, %192 : vector<2x10xf32>
    %209 = arith.mulf %204, %206 : vector<2x10xf32>
    %210 = arith.addf %208, %209 : vector<2x10xf32>
    %211 = math.tanh %210 : vector<2x10xf32>
    %212 = arith.mulf %207, %211 : vector<2x10xf32>
    %213 = vector.extract_strided_slice %158 {offsets = [6, 0], sizes = [2, 40], strides = [1, 1]} : vector<16x40xf32> to vector<2x40xf32>
    %cst_37 = arith.constant dense<0.000000e+00> : vector<2x40xf32>
    %214 = tpu.matmul %212, %1, %cst_37 {dimension_numbers = #tpu.dot_dimension_numbers<[1], [0], [0], [1], [0, 0, 1, 1], [], []>} : vector<2x10xf32>, vector<10x40xf32>, vector<2x40xf32> -> vector<2x40xf32>
    %215 = arith.addf %213, %214 : vector<2x40xf32>
    %216 = arith.negf %215 : vector<2x40xf32>
    %217 = math.exp %216 : vector<2x40xf32>
    %cst_38 = arith.constant 1.000000e+00 : f32
    %218 = vector.broadcast %cst_38 : f32 to vector<2x40xf32>
    %219 = arith.addf %218, %217 : vector<2x40xf32>
    %220 = arith.divf %218, %219 : vector<2x40xf32>
    %221 = math.tanh %215 : vector<2x40xf32>
    %222 = vector.extract_strided_slice %220 {offsets = [0, 0], sizes = [2, 10], strides = [1, 1]} : vector<2x40xf32> to vector<2x10xf32>
    %223 = vector.extract_strided_slice %220 {offsets = [0, 10], sizes = [2, 10], strides = [1, 1]} : vector<2x40xf32> to vector<2x10xf32>
    %224 = vector.extract_strided_slice %221 {offsets = [0, 20], sizes = [2, 10], strides = [1, 1]} : vector<2x40xf32> to vector<2x10xf32>
    %225 = vector.extract_strided_slice %220 {offsets = [0, 30], sizes = [2, 10], strides = [1, 1]} : vector<2x40xf32> to vector<2x10xf32>
    %226 = arith.mulf %223, %210 : vector<2x10xf32>
    %227 = arith.mulf %222, %224 : vector<2x10xf32>
    %228 = arith.addf %226, %227 : vector<2x10xf32>
    %229 = math.tanh %228 : vector<2x10xf32>
    %230 = arith.mulf %225, %229 : vector<2x10xf32>
    %231 = vector.extract_strided_slice %158 {offsets = [8, 0], sizes = [2, 40], strides = [1, 1]} : vector<16x40xf32> to vector<2x40xf32>
    %cst_39 = arith.constant dense<0.000000e+00> : vector<2x40xf32>
    %232 = tpu.matmul %230, %1, %cst_39 {dimension_numbers = #tpu.dot_dimension_numbers<[1], [0], [0], [1], [0, 0, 1, 1], [], []>} : vector<2x10xf32>, vector<10x40xf32>, vector<2x40xf32> -> vector<2x40xf32>
    %233 = arith.addf %231, %232 : vector<2x40xf32>
    %234 = arith.negf %233 : vector<2x40xf32>
    %235 = math.exp %234 : vector<2x40xf32>
    %cst_40 = arith.constant 1.000000e+00 : f32
    %236 = vector.broadcast %cst_40 : f32 to vector<2x40xf32>
    %237 = arith.addf %236, %235 : vector<2x40xf32>
    %238 = arith.divf %236, %237 : vector<2x40xf32>
    %239 = math.tanh %233 : vector<2x40xf32>
    %240 = vector.extract_strided_slice %238 {offsets = [0, 0], sizes = [2, 10], strides = [1, 1]} : vector<2x40xf32> to vector<2x10xf32>
    %241 = vector.extract_strided_slice %238 {offsets = [0, 10], sizes = [2, 10], strides = [1, 1]} : vector<2x40xf32> to vector<2x10xf32>
    %242 = vector.extract_strided_slice %239 {offsets = [0, 20], sizes = [2, 10], strides = [1, 1]} : vector<2x40xf32> to vector<2x10xf32>
    %243 = vector.extract_strided_slice %238 {offsets = [0, 30], sizes = [2, 10], strides = [1, 1]} : vector<2x40xf32> to vector<2x10xf32>
    %244 = arith.mulf %241, %228 : vector<2x10xf32>
    %245 = arith.mulf %240, %242 : vector<2x10xf32>
    %246 = arith.addf %244, %245 : vector<2x10xf32>
    %247 = math.tanh %246 : vector<2x10xf32>
    %248 = arith.mulf %243, %247 : vector<2x10xf32>
    %249 = vector.extract_strided_slice %158 {offsets = [10, 0], sizes = [2, 40], strides = [1, 1]} : vector<16x40xf32> to vector<2x40xf32>
    %cst_41 = arith.constant dense<0.000000e+00> : vector<2x40xf32>
    %250 = tpu.matmul %248, %1, %cst_41 {dimension_numbers = #tpu.dot_dimension_numbers<[1], [0], [0], [1], [0, 0, 1, 1], [], []>} : vector<2x10xf32>, vector<10x40xf32>, vector<2x40xf32> -> vector<2x40xf32>
    %251 = arith.addf %249, %250 : vector<2x40xf32>
    %252 = arith.negf %251 : vector<2x40xf32>
    %253 = math.exp %252 : vector<2x40xf32>
    %cst_42 = arith.constant 1.000000e+00 : f32
    %254 = vector.broadcast %cst_42 : f32 to vector<2x40xf32>
    %255 = arith.addf %254, %253 : vector<2x40xf32>
    %256 = arith.divf %254, %255 : vector<2x40xf32>
    %257 = math.tanh %251 : vector<2x40xf32>
    %258 = vector.extract_strided_slice %256 {offsets = [0, 0], sizes = [2, 10], strides = [1, 1]} : vector<2x40xf32> to vector<2x10xf32>
    %259 = vector.extract_strided_slice %256 {offsets = [0, 10], sizes = [2, 10], strides = [1, 1]} : vector<2x40xf32> to vector<2x10xf32>
    %260 = vector.extract_strided_slice %257 {offsets = [0, 20], sizes = [2, 10], strides = [1, 1]} : vector<2x40xf32> to vector<2x10xf32>
    %261 = vector.extract_strided_slice %256 {offsets = [0, 30], sizes = [2, 10], strides = [1, 1]} : vector<2x40xf32> to vector<2x10xf32>
    %262 = arith.mulf %259, %246 : vector<2x10xf32>
    %263 = arith.mulf %258, %260 : vector<2x10xf32>
    %264 = arith.addf %262, %263 : vector<2x10xf32>
    %265 = math.tanh %264 : vector<2x10xf32>
    %266 = arith.mulf %261, %265 : vector<2x10xf32>
    %267 = vector.extract_strided_slice %158 {offsets = [12, 0], sizes = [2, 40], strides = [1, 1]} : vector<16x40xf32> to vector<2x40xf32>
    %cst_43 = arith.constant dense<0.000000e+00> : vector<2x40xf32>
    %268 = tpu.matmul %266, %1, %cst_43 {dimension_numbers = #tpu.dot_dimension_numbers<[1], [0], [0], [1], [0, 0, 1, 1], [], []>} : vector<2x10xf32>, vector<10x40xf32>, vector<2x40xf32> -> vector<2x40xf32>
    %269 = arith.addf %267, %268 : vector<2x40xf32>
    %270 = arith.negf %269 : vector<2x40xf32>
    %271 = math.exp %270 : vector<2x40xf32>
    %cst_44 = arith.constant 1.000000e+00 : f32
    %272 = vector.broadcast %cst_44 : f32 to vector<2x40xf32>
    %273 = arith.addf %272, %271 : vector<2x40xf32>
    %274 = arith.divf %272, %273 : vector<2x40xf32>
    %275 = math.tanh %269 : vector<2x40xf32>
    %276 = vector.extract_strided_slice %274 {offsets = [0, 0], sizes = [2, 10], strides = [1, 1]} : vector<2x40xf32> to vector<2x10xf32>
    %277 = vector.extract_strided_slice %274 {offsets = [0, 10], sizes = [2, 10], strides = [1, 1]} : vector<2x40xf32> to vector<2x10xf32>
    %278 = vector.extract_strided_slice %275 {offsets = [0, 20], sizes = [2, 10], strides = [1, 1]} : vector<2x40xf32> to vector<2x10xf32>
    %279 = vector.extract_strided_slice %274 {offsets = [0, 30], sizes = [2, 10], strides = [1, 1]} : vector<2x40xf32> to vector<2x10xf32>
    %280 = arith.mulf %277, %264 : vector<2x10xf32>
    %281 = arith.mulf %276, %278 : vector<2x10xf32>
    %282 = arith.addf %280, %281 : vector<2x10xf32>
    %283 = math.tanh %282 : vector<2x10xf32>
    %284 = arith.mulf %279, %283 : vector<2x10xf32>
    %285 = vector.extract_strided_slice %158 {offsets = [14, 0], sizes = [2, 40], strides = [1, 1]} : vector<16x40xf32> to vector<2x40xf32>
    %cst_45 = arith.constant dense<0.000000e+00> : vector<2x40xf32>
    %286 = tpu.matmul %284, %1, %cst_45 {dimension_numbers = #tpu.dot_dimension_numbers<[1], [0], [0], [1], [0, 0, 1, 1], [], []>} : vector<2x10xf32>, vector<10x40xf32>, vector<2x40xf32> -> vector<2x40xf32>
    %287 = arith.addf %285, %286 : vector<2x40xf32>
    %288 = arith.negf %287 : vector<2x40xf32>
    %289 = math.exp %288 : vector<2x40xf32>
    %cst_46 = arith.constant 1.000000e+00 : f32
    %290 = vector.broadcast %cst_46 : f32 to vector<2x40xf32>
    %291 = arith.addf %290, %289 : vector<2x40xf32>
    %292 = arith.divf %290, %291 : vector<2x40xf32>
    %293 = math.tanh %287 : vector<2x40xf32>
    %294 = vector.extract_strided_slice %292 {offsets = [0, 0], sizes = [2, 10], strides = [1, 1]} : vector<2x40xf32> to vector<2x10xf32>
    %295 = vector.extract_strided_slice %292 {offsets = [0, 10], sizes = [2, 10], strides = [1, 1]} : vector<2x40xf32> to vector<2x10xf32>
    %296 = vector.extract_strided_slice %293 {offsets = [0, 20], sizes = [2, 10], strides = [1, 1]} : vector<2x40xf32> to vector<2x10xf32>
    %297 = vector.extract_strided_slice %292 {offsets = [0, 30], sizes = [2, 10], strides = [1, 1]} : vector<2x40xf32> to vector<2x10xf32>
    %298 = arith.mulf %295, %282 : vector<2x10xf32>
    %299 = arith.mulf %294, %296 : vector<2x10xf32>
    %300 = arith.addf %298, %299 : vector<2x10xf32>
    %301 = math.tanh %300 : vector<2x10xf32>
    %302 = arith.mulf %297, %301 : vector<2x10xf32>
    %c0_47 = arith.constant 0 : index
    %c0_48 = arith.constant 0 : index
    %303 = vector.load %arg7[%c0_47, %c0_48] : memref<10x3xf32, #tpu.memory_space<vmem>>, vector<10x3xf32>
    %cst_49 = arith.constant dense<0.000000e+00> : vector<2x3xf32>
    %304 = tpu.matmul %302, %303, %cst_49 {dimension_numbers = #tpu.dot_dimension_numbers<[1], [0], [0], [1], [0, 0, 1, 1], [], []>} : vector<2x10xf32>, vector<10x3xf32>, vector<2x3xf32> -> vector<2x3xf32>
    %c0_50 = arith.constant 0 : index
    %c0_51 = arith.constant 0 : index
    %305 = vector.load %arg8[%c0_50, %c0_51] : memref<1x3xf32, #tpu.memory_space<vmem>>, vector<1x3xf32>
    %306 = vector.broadcast %305 : vector<1x3xf32> to vector<2x3xf32>
    %307 = arith.addf %304, %306 : vector<2x3xf32>
    %c0_52 = arith.constant 0 : index
    %c0_53 = arith.constant 0 : index
    %308 = vector.load %arg9[%c0_52, %c0_53] : memref<2x3xf32, #tpu.memory_space<vmem>>, vector<2x3xf32>
    tpu.vector_store %arg9[%c0_52, %c0_53], %307 {strides = array<i32>} : memref<2x3xf32, #tpu.memory_space<vmem>>, vector<2x3xf32>,
    return
  }
}

</mosaic_0001>

<bundles_post_ra>
// kernel: jet_position_lstm.1
= control target key start
LH: loop header
LB: loop body
LE: loop exit
PB: predicated region body
PF: predicated region fallthrough
CT: control target
= control target key end

     0   :  { %14 = vsyncpa [#allocation3], 0  ;;  %s1839_s0 = inlined_call_operand.vmem [shape: f32[16,3], index: 0, kind: input, shape index: {}]   ;;  %s1840_s1 = inlined_call_operand.vmem [shape: f32[3,40], index: 1, kind: input, shape index: {}]   ;;  %s1841_s2 = inlined_call_operand.vmem [shape: f32[10,40], index: 2, kind: input, shape index: {}]   ;;  %s1842_s3 = inlined_call_operand.vmem [shape: f32[1,40], index: 3, kind: input, shape index: {}]   ;;  %s1843_s4 = inlined_call_operand.vmem [shape: f32[10,40], index: 4, kind: input, shape index: {}]   ;;  %s1844_s5 = inlined_call_operand.hbm [shape: f32[10,40], index: 5, kind: input, shape index: {}]   ;;  %s1845_s6 = inlined_call_operand.vmem [shape: f32[1,40], index: 6, kind: input, shape index: {}]   ;;  %s1846_s7 = inlined_call_operand.vmem [shape: f32[10,3], index: 7, kind: input, shape index: {}]   ;;  %s1847_s8 = inlined_call_operand.vmem [shape: f32[1,3], index: 8, kind: input, shape index: {}]   ;;  %s1848_s9 = inlined_call_operand.hbm [shape: f32[2,3], index: 9, kind: output, shape index: {}]  }
   0x1   :  { %15 = vsyncpa [#allocation4], 0  ;;  %s30_s11 = sshll.u32 %s1844_s5, 4  ;;  %s1541_s12 = smov [#allocation2]   ;;  %s31_s11 = int_to_ptr.hbm [resolvable:$true] %s30_s11 }
   0x2   :  { %s32_s13 = sshll.u32 %s1541_s12, 4  ;;  %s1542_s14 = smov 128   ;;  %s33_s13 = int_to_ptr.vmem [resolvable:$true] %s32_s13 }
   0x3   :  { %s1543_s15 = smov 8  }
   0x4   :  { %38 = dma.hbm_to_vmem [thread:$0]  %s31_s11, 256, %s33_s13, [#allocation3], %s1542_s14, %s1542_s14, %s1543_s15  }
   0x5   :  { %1537 = dma.done.wait [#allocation3], 256  }
   0x6   :  { %1538 = vsyncadd [#allocation3], 4294967040  ;;  %vm67_vm0 = vcmask 1042432   ;;  %vm98_vm1 = vcmask 1041408   ;;  %vm60_vm2 = vcmask 23552   ;;  %v53_v2 = vld [vmem:[%s1839_s0] sm:$0xff] }
   0x7   :  { %v55_v0 = vld [vmem:[%s1840_s1] sm:$0x7]  ;;  %v50_v1 = vld [vmem:[%s1841_s2 + $0x8] sm:$0x3]  ;;  %v1544_v4 = vmov 0.0   ;;  %s1545_s23 = smov 108  }
   0x8   :  { %1295 = vmatpush.msk.msra.mxu0 %vm67_vm0, %v55_v0  ;;  %1298 = vmatpush.msk.msra.mxu1 %vm98_vm1, %v50_v1  ;;  %v49_v3 = vld [vmem:[%s1841_s2] sm:$0xff]  ;;  %s1547_s24 = smov 20   ;;  %s1548_s25 = smov 98   ;;  %vm94_vm7 = vcmask 80896   ;;  %vm646_vm0 = vcmask 1043456  }
   0x9   :  { %1296 = vmatmul.msk.f32.vlgmr.msra.gmra.mxu0 %vm60_vm2, %v53_v2  ;;  %1300 = vmatpush.msk.msra.mxu2 %vm98_vm1, %v50_v1  ;;  %v1628_v5 = vld [vmem:[%s1842_s3] ss:$0 sm:$0xff]  ;;  %s1546_s3 = smov 10   ;;  %s1549_s16 = smov [#allocation5]  }
   0xa   :  { %117 = vmatpush.msra.mxu1 %v49_v3  ;;  %1303 = vmatpush.msk.msra.mxu3 %vm98_vm1, %v50_v1  ;;  %s1283_s17 = sshll.u32 %s1549_s16, 4  ;;  %s1284_s17 = int_to_ptr.vmem [resolvable:$true] %s1283_s17 }
   0xb   :  { %118 = vmatmul.f32.vlgmr.msra.gmra.mxu1 %v1544_v4  ;;  %180 = vmatpush.msra.mxu2 %v49_v3 }
   0xc   :  { %250 = vmatpush.msra.mxu3 %v49_v3  ;;  %1306 = vmatpush.msk.msrb.mxu1 %vm98_vm1, %v50_v1 }
   0xd   :  { %1309 = vmatpush.msk.msrb.mxu2 %vm98_vm1, %v50_v1  ;;  %1315 = vmatpush.msk.msrb.mxu0 %vm98_vm1, %v50_v1 }
   0xe   :  { %1312 = vmatpush.msk.msrb.mxu3 %vm98_vm1, %v50_v1  ;;  %320 = vmatpush.msrb.mxu1 %v49_v3 }
   0xf   :  { %390 = vmatpush.msrb.mxu2 %v49_v3  ;;  %526 = vmatpush.msrb.mxu0 %v49_v3 }
  0x10   :  { %456 = vmatpush.msrb.mxu3 %v49_v3  ;;  %1318 = vmatpush.msk.msra.mxu1 %vm98_vm1, %v50_v1 }
  0x12   :  { %596 = vmatpush.msra.mxu1 %v49_v3 }
  0x86   :  { %v88_v6 = vpop.f32.mrf.mxu0 }
  0x87   :  { %v1631_v7 = vadd.f32 %v1628_v5, %v88_v6 }
  0x88   :  { %v119_v8 = vpop.f32.mrf.mxu1 }
  0x89   :  { %v122_v9 = vadd.f32 %v119_v8, %v1631_v7 }
  0x8b   :  { %1361 = vtanh.f32 %v122_v9  ;;  %v1299_v11 = vmul.f32 -1.442695, %v122_v9 }
  0x8d   :  { %1363 = vpow2.f32 %v1299_v11 }
  0x91   :  { %v1362_v10 = vpop.eup %1361 }
  0x92   :  { %145 = vrot.lane.b32.xlu0 %v1362_v10, %s1545_s23 }
  0x93   :  { %v1364_v12 = vpop.eup %1363 }
  0x94   :  { %v126_v13 = vadd.f32 1.0, %v1364_v12 }
  0x96   :  { %1365 = vrcp.f32 %v126_v13  ;;  %v138_v19 = vand.u32 2147483648, %v126_v13  ;;  %vm132_vm4 = vweird.f32 %v126_v13  ;;  %v136_v20 = vand.u32 2147483647, %v126_v13 }
  0x98   :  { %v139_v22 = vor.u32 1.1754944e-38, %v138_v19  ;;  %vm137_vm6 = vcmp.eq.f32.partialorder %v136_v20, 8.507059e+37 }
  0x9c   :  { %v1366_v14 = vpop.eup %1365 }
  0x9d   :  { %v128_v15 = vmul.f32 %v1366_v14, %v126_v13  ;;  %vm133_vm3 = vweird.f32 %v1366_v14 }
  0x9e   :  { %vm134_vm5 = vmor %vm132_vm4, %vm133_vm3 }
  0x9f   :  { %v129_v16 = vsub.f32 1.0, %v128_v15 }
  0xa1   :  { %v130_v17 = vmul.f32 %v1366_v14, %v129_v16 }
  0xa3   :  { %v131_v18 = vadd.f32 %v1366_v14, %v130_v17 }
  0xa5   :  { %v135_v21 = vsel %vm134_vm5, %v1366_v14, %v131_v18 }
  0xa6   :  { %v140_v24 = vsel %vm137_vm6, %v139_v22, %v135_v21 }
  0xa7   :  { %v143_v26 = vmul.f32 0.0, %v140_v24 }
 0x104   :  { %v146_v23 = vpop.permute.xlu0 %145 }
 0x105   :  { %v148_v25 = vmul.f32 %v146_v23, %v140_v24 }
 0x107   :  { %150 = vrot.lane.b32.xlu0 %v148_v25, %s1546_s3 }
 0x179   :  { %v151_v27 = vpop.permute.xlu0 %150 }
 0x17a   :  { %v153_v28 = vadd.f32 %v151_v27, %v143_v26 }
 0x17c   :  { %1367 = vtanh.f32 %v153_v28  ;;  %v210_v52 = vrot.slane %v153_v28, 6 }
 0x182   :  { %v1368_v29 = vpop.eup %1367 }
 0x183   :  { %156 = vrot.lane.b32.xlu1 %v1368_v29, %s1547_s24 }
 0x1f5   :  { %v157_v30 = vpop.permute.xlu1 %156 }
 0x1f6   :  { %v1637_v31 = vmul.f32 %v157_v30, %v140_v24 }
 0x1f8   :  { %161 = vrot.lane.b32.xlu1 %v1637_v31, %s1548_s25 }
 0x26a   :  { %v162_v32 = vpop.permute.xlu1 %161 }
 0x26b   :  { %1301 = vmatmul.msk.f32.vlgmr.msra.gmra.mxu2 %vm94_vm7, %v162_v32 }
 0x2ee   :  { %v182_v33 = vpop.f32.mrf.mxu2 }
 0x2ef   :  { %v186_v34 = vrot.slane %v182_v33, 6 }
 0x2f1   :  { %v188_v35 = vadd.f32 %v186_v34, %v1631_v7 }
 0x2f3   :  { %1369 = vtanh.f32 %v188_v35  ;;  %v1302_v37 = vmul.f32 -1.442695, %v188_v35 }
 0x2f5   :  { %1371 = vpow2.f32 %v1302_v37 }
 0x2f9   :  { %v1370_v36 = vpop.eup %1369 }
 0x2fa   :  { %214 = vrot.lane.b32.xlu2 %v1370_v36, %s1545_s23 }
 0x2fb   :  { %v1372_v38 = vpop.eup %1371 }
 0x2fc   :  { %v192_v39 = vadd.f32 1.0, %v1372_v38 }
 0x2fe   :  { %1373 = vrcp.f32 %v192_v39  ;;  %v204_v45 = vand.u32 2147483648, %v192_v39  ;;  %vm198_vm9 = vweird.f32 %v192_v39  ;;  %v202_v46 = vand.u32 2147483647, %v192_v39 }
 0x300   :  { %v205_v48 = vor.u32 1.1754944e-38, %v204_v45  ;;  %vm203_vm11 = vcmp.eq.f32.partialorder %v202_v46, 8.507059e+37 }
 0x304   :  { %v1374_v40 = vpop.eup %1373 }
 0x305   :  { %v194_v41 = vmul.f32 %v1374_v40, %v192_v39  ;;  %vm199_vm8 = vweird.f32 %v1374_v40 }
 0x306   :  { %vm200_vm10 = vmor %vm198_vm9, %vm199_vm8  ;;  %vm648_vm8 = vcmask 1045504  }
 0x307   :  { %v195_v42 = vsub.f32 1.0, %v194_v41 }
 0x309   :  { %v196_v43 = vmul.f32 %v1374_v40, %v195_v42 }
 0x30b   :  { %v197_v44 = vadd.f32 %v1374_v40, %v196_v43 }
 0x30d   :  { %v201_v47 = vsel %vm200_vm10, %v1374_v40, %v197_v44 }
 0x30e   :  { %v206_v50 = vsel %vm203_vm11, %v205_v48, %v201_v47 }
 0x30f   :  { %v212_v53 = vmul.f32 %v210_v52, %v206_v50 }
 0x354   :  { %v215_v49 = vpop.permute.xlu2 %214 }
 0x355   :  { %v217_v51 = vmul.f32 %v215_v49, %v206_v50 }
 0x357   :  { %219 = vrot.lane.b32.xlu2 %v217_v51, %s1546_s3 }
 0x3b1   :  { %v220_v54 = vpop.permute.xlu2 %219 }
 0x3b2   :  { %v222_v55 = vadd.f32 %v220_v54, %v212_v53 }
 0x3b4   :  { %1375 = vtanh.f32 %v222_v55  ;;  %v280_v19 = vrot.slane %v222_v55, 6 }
 0x3ba   :  { %v1376_v56 = vpop.eup %1375 }
 0x3bb   :  { %225 = vrot.lane.b32.xlu0 %v1376_v56, %s1547_s24 }
 0x42d   :  { %v226_v57 = vpop.permute.xlu0 %225 }
 0x42e   :  { %v228_v58 = vmul.f32 %v226_v57, %v206_v50  ;;  %v54_v57 = vld [vmem:[%s1839_s0 + $0x8] sm:$0xff] }
 0x42f   :  { %1297 = vmatmul.msk.f32.gmra.mxu0 %vm60_vm2, %v54_v57 }
 0x430   :  { %v230_v59 = vrot.slane %v228_v58, 2  ;;  %v645_v26 = vsel %vm98_vm1, %v1637_v31, %v228_v58 }
 0x432   :  { %231 = vrot.lane.b32.xlu1 %v230_v59, %s1548_s25 }
 0x4a4   :  { %v232_v60 = vpop.permute.xlu1 %231 }
 0x4a5   :  { %1304 = vmatmul.msk.f32.vlgmr.msra.gmra.mxu3 %vm94_vm7, %v232_v60 }
 0x4ac   :  { %v91_v59 = vpop.f32.mrf.mxu0 }
 0x4ad   :  { %v1669_v60 = vadd.f32 %v1628_v5, %v91_v59 }
 0x528   :  { %v252_v61 = vpop.f32.mrf.mxu3 }
 0x529   :  { %v256_v62 = vrot.slane %v252_v61, 4 }
 0x52b   :  { %v258_v63 = vadd.f32 %v256_v62, %v1631_v7 }
 0x52d   :  { %1377 = vtanh.f32 %v258_v63  ;;  %v1305_v1 = vmul.f32 -1.442695, %v258_v63 }
 0x52f   :  { %1379 = vpow2.f32 %v1305_v1 }
 0x533   :  { %v1378_v0 = vpop.eup %1377 }
 0x534   :  { %284 = vrot.lane.b32.xlu2 %v1378_v0, %s1545_s23 }
 0x535   :  { %v1380_v2 = vpop.eup %1379 }
 0x536   :  { %v262_v3 = vadd.f32 1.0, %v1380_v2 }
 0x538   :  { %1381 = vrcp.f32 %v262_v3  ;;  %v274_v12 = vand.u32 2147483648, %v262_v3  ;;  %vm268_vm13 = vweird.f32 %v262_v3  ;;  %v272_v13 = vand.u32 2147483647, %v262_v3 }
 0x53a   :  { %v275_v15 = vor.u32 1.1754944e-38, %v274_v12  ;;  %vm273_vm15 = vcmp.eq.f32.partialorder %v272_v13, 8.507059e+37 }
 0x53e   :  { %v1382_v6 = vpop.eup %1381 }
 0x53f   :  { %v264_v8 = vmul.f32 %v1382_v6, %v262_v3  ;;  %vm269_vm12 = vweird.f32 %v1382_v6 }
 0x540   :  { %vm270_vm14 = vmor %vm268_vm13, %vm269_vm12 }
 0x541   :  { %v265_v9 = vsub.f32 1.0, %v264_v8 }
 0x543   :  { %v266_v10 = vmul.f32 %v1382_v6, %v265_v9 }
 0x545   :  { %v267_v11 = vadd.f32 %v1382_v6, %v266_v10 }
 0x547   :  { %v271_v14 = vsel %vm270_vm14, %v1382_v6, %v267_v11 }
 0x548   :  { %v276_v17 = vsel %vm273_vm15, %v275_v15, %v271_v14 }
 0x549   :  { %v282_v20 = vmul.f32 %v280_v19, %v276_v17 }
 0x58e   :  { %v285_v16 = vpop.permute.xlu2 %284 }
 0x58f   :  { %v287_v18 = vmul.f32 %v285_v16, %v276_v17 }
 0x591   :  { %289 = vrot.lane.b32.xlu0 %v287_v18, %s1546_s3  ;;  %v653_v18 = vld [vmem:[%s1843_s4] sm:$0xff] }
 0x603   :  { %v290_v21 = vpop.permute.xlu0 %289 }
 0x604   :  { %v292_v22 = vadd.f32 %v290_v21, %v282_v20 }
 0x606   :  { %1383 = vtanh.f32 %v292_v22  ;;  %v350_v48 = vrot.slane %v292_v22, 6 }
 0x60c   :  { %v1384_v23 = vpop.eup %1383 }
 0x60d   :  { %295 = vrot.lane.b32.xlu1 %v1384_v23, %s1547_s24 }
 0x67f   :  { %v296_v24 = vpop.permute.xlu1 %295 }
 0x680   :  { %v298_v25 = vmul.f32 %v296_v24, %v276_v17  ;;  %v654_v17 = vld [vmem:[%s1843_s4 + $0x8] sm:$0x3] }
 0x681   :  { %1321 = vmatpush.msk.msra.mxu2 %vm98_vm1, %v654_v17 }
 0x682   :  { %v300_v27 = vrot.slane %v298_v25, 4  ;;  %v647_v28 = vsel %vm646_vm0, %v645_v26, %v298_v25 }
 0x683   :  { %687 = vmatpush.msra.mxu2 %v653_v18 }
 0x684   :  { %301 = vrot.lane.b32.xlu2 %v300_v27, %s1548_s25  ;;  %v1691_v27 = vld [vmem:[#allocation2 + $0x8] sm:$0x3] }
 0x685   :  { %1324 = vmatpush.msk.msra.mxu3 %vm98_vm1, %v1691_v27  ;;  %1326 = vmatpush.msk.msra.mxu0 %vm98_vm1, %v1691_v27 }
 0x6de   :  { %v302_v29 = vpop.permute.xlu2 %301 }
 0x6df   :  { %1307 = vmatmul.msk.f32.vlgmr.msrb.gmra.mxu1 %vm94_vm7, %v302_v29 }
 0x6e0   :  { %1329 = vmatpush.msk.msrb.mxu1 %vm98_vm1, %v1691_v27 }
 0x75c   :  { %v322_v30 = vpop.f32.mrf.mxu1 }
 0x75d   :  { %v326_v32 = vrot.slane %v322_v30, 2 }
 0x75f   :  { %v328_v33 = vadd.f32 %v326_v32, %v1631_v7 }
 0x761   :  { %1385 = vtanh.f32 %v328_v33  ;;  %v1308_v35 = vmul.f32 -1.442695, %v328_v33  ;;  %v1718_v33 = vld [vmem:[%s1845_s6] ss:$0 sm:$0xff] }
 0x763   :  { %1387 = vpow2.f32 %v1308_v35 }
 0x767   :  { %v1386_v34 = vpop.eup %1385 }
 0x768   :  { %354 = vrot.lane.b32.xlu0 %v1386_v34, %s1545_s23 }
 0x769   :  { %v1388_v36 = vpop.eup %1387 }
 0x76a   :  { %v332_v31 = vadd.f32 1.0, %v1388_v36 }
 0x76c   :  { %1389 = vrcp.f32 %v332_v31  ;;  %v344_v42 = vand.u32 2147483648, %v332_v31  ;;  %vm338_vm4 = vweird.f32 %v332_v31  ;;  %v342_v43 = vand.u32 2147483647, %v332_v31 }
 0x76e   :  { %v345_v44 = vor.u32 1.1754944e-38, %v344_v42  ;;  %vm343_vm6 = vcmp.eq.f32.partialorder %v342_v43, 8.507059e+37 }
 0x772   :  { %v1390_v37 = vpop.eup %1389 }
 0x773   :  { %v334_v38 = vmul.f32 %v1390_v37, %v332_v31  ;;  %vm339_vm3 = vweird.f32 %v1390_v37 }
 0x774   :  { %vm340_vm5 = vmor %vm338_vm4, %vm339_vm3 }
 0x775   :  { %v335_v39 = vsub.f32 1.0, %v334_v38 }
 0x777   :  { %v336_v40 = vmul.f32 %v1390_v37, %v335_v39 }
 0x779   :  { %v337_v41 = vadd.f32 %v1390_v37, %v336_v40 }
 0x77b   :  { %v341_v7 = vsel %vm340_vm5, %v1390_v37, %v337_v41 }
 0x77c   :  { %v346_v46 = vsel %vm343_vm6, %v345_v44, %v341_v7 }
 0x77d   :  { %v352_v49 = vmul.f32 %v350_v48, %v346_v46 }
 0x7da   :  { %v355_v45 = vpop.permute.xlu0 %354 }
 0x7db   :  { %v357_v47 = vmul.f32 %v355_v45, %v346_v46 }
 0x7dd   :  { %359 = vrot.lane.b32.xlu1 %v357_v47, %s1546_s3 }
 0x84f   :  { %v360_v50 = vpop.permute.xlu1 %359 }
 0x850   :  { %v362_v51 = vadd.f32 %v360_v50, %v352_v49 }
 0x852   :  { %1391 = vtanh.f32 %v362_v51  ;;  %v417_v19 = vrot.slane %v362_v51, 6 }
 0x858   :  { %v1392_v52 = vpop.eup %1391 }
 0x859   :  { %365 = vrot.lane.b32.xlu2 %v1392_v52, %s1547_s24 }
 0x8b3   :  { %v366_v53 = vpop.permute.xlu2 %365 }
 0x8b4   :  { %v368_v54 = vmul.f32 %v366_v53, %v346_v46 }
 0x8b6   :  { %v370_v55 = vrot.slane %v368_v54, 6  ;;  %v649_v56 = vsel %vm648_vm8, %v647_v28, %v368_v54  ;;  %v1693_v28 = vld [vmem:[#allocation2] sm:$0xff] }
 0x8b7   :  { %713 = vmatpush.msra.mxu3 %v1693_v28  ;;  %776 = vmatpush.msra.mxu0 %v1693_v28 }
 0x8b8   :  { %371 = vrot.lane.b32.xlu0 %v370_v55, %s1548_s25  ;;  %846 = vmatpush.msrb.mxu1 %v1693_v28 }
 0x92a   :  { %v372_v58 = vpop.permute.xlu0 %371 }
 0x92b   :  { %1310 = vmatmul.msk.f32.vlgmr.msrb.gmra.mxu2 %vm94_vm7, %v372_v58 }
 0x92c   :  { %1341 = vmatpush.msk.msrb.mxu2 %vm98_vm1, %v1691_v27 }
 0x92e   :  { %1122 = vmatpush.msrb.mxu2 %v1693_v28 }
 0x9ae   :  { %v392_v61 = vpop.f32.mrf.mxu2 }
 0x9af   :  { %v395_v62 = vadd.f32 %v392_v61, %v1669_v60 }
 0x9b1   :  { %1393 = vtanh.f32 %v395_v62  ;;  %v1311_v0 = vmul.f32 -1.442695, %v395_v62 }
 0x9b3   :  { %1395 = vpow2.f32 %v1311_v0 }
 0x9b7   :  { %v1394_v63 = vpop.eup %1393 }
 0x9b8   :  { %421 = vrot.lane.b32.xlu1 %v1394_v63, %s1545_s23 }
 0x9b9   :  { %v1396_v1 = vpop.eup %1395 }
 0x9ba   :  { %v399_v2 = vadd.f32 1.0, %v1396_v1 }
 0x9bc   :  { %1397 = vrcp.f32 %v399_v2  ;;  %v411_v5 = vand.u32 2147483648, %v399_v2  ;;  %vm405_vm9 = vweird.f32 %v399_v2  ;;  %v409_v11 = vand.u32 2147483647, %v399_v2 }
 0x9be   :  { %v412_v13 = vor.u32 1.1754944e-38, %v411_v5  ;;  %vm410_vm11 = vcmp.eq.f32.partialorder %v409_v11, 8.507059e+37 }
 0x9c2   :  { %v1398_v3 = vpop.eup %1397 }
 0x9c3   :  { %v401_v6 = vmul.f32 %v1398_v3, %v399_v2  ;;  %vm406_vm2 = vweird.f32 %v1398_v3 }
 0x9c4   :  { %vm407_vm10 = vmor %vm405_vm9, %vm406_vm2 }
 0x9c5   :  { %v402_v8 = vsub.f32 1.0, %v401_v6 }
 0x9c7   :  { %v403_v9 = vmul.f32 %v1398_v3, %v402_v8 }
 0x9c9   :  { %v404_v10 = vadd.f32 %v1398_v3, %v403_v9 }
 0x9cb   :  { %v408_v12 = vsel %vm407_vm10, %v1398_v3, %v404_v10 }
 0x9cc   :  { %v413_v15 = vsel %vm410_vm11, %v412_v13, %v408_v12 }
 0x9cd   :  { %v419_v20 = vmul.f32 %v417_v19, %v413_v15 }
 0xa2a   :  { %v422_v14 = vpop.permute.xlu1 %421 }
 0xa2b   :  { %v424_v16 = vmul.f32 %v422_v14, %v413_v15 }
 0xa2d   :  { %426 = vrot.lane.b32.xlu2 %v424_v16, %s1546_s3 }
 0xa35   :  { %661 = vrot.lane.b32.xlu2 %v649_v56, %s1548_s25 }
 0xa87   :  { %v427_v21 = vpop.permute.xlu2 %426 }
 0xa88   :  { %v1682_v22 = vadd.f32 %v427_v21, %v419_v20 }
 0xa8a   :  { %1399 = vtanh.f32 %v1682_v22  ;;  %v486_v8 = vrot.slane %v1682_v22, 6 }
 0xa8f   :  { %v662_v23 = vpop.permute.xlu2 %661 }
 0xa90   :  { %v1400_v24 = vpop.eup %1399  ;;  %1322 = vmatmul.msk.f32.vlgmr.msra.gmra.mxu2 %vm94_vm7, %v662_v23 }
 0xa91   :  { %432 = vrot.lane.b32.xlu0 %v1400_v24, %s1547_s24 }
 0xb03   :  { %v433_v25 = vpop.permute.xlu0 %432 }
 0xb04   :  { %v1687_v26 = vmul.f32 %v433_v25, %v413_v15 }
 0xb06   :  { %437 = vrot.lane.b32.xlu1 %v1687_v26, %s1548_s25 }
 0xb13   :  { %v689_v35 = vpop.f32.mrf.mxu2 }
 0xb14   :  { %v1722_v36 = vadd.f32 %v1718_v33, %v689_v35 }
 0xb78   :  { %v438_v29 = vpop.permute.xlu1 %437 }
 0xb79   :  { %1313 = vmatmul.msk.f32.vlgmr.msrb.gmra.mxu3 %vm94_vm7, %v438_v29 }
 0xb7a   :  { %1332 = vmatpush.msk.msrb.mxu3 %vm98_vm1, %v1691_v27 }
 0xb7c   :  { %916 = vmatpush.msrb.mxu3 %v1693_v28 }
 0xb81   :  { %714 = vmatmul.f32.vlgmr.msra.gmra.mxu3 %v1544_v4 }
 0xb82   :  { %1344 = vmatpush.msk.msra.mxu3 %vm98_vm1, %v1691_v27 }
 0xb84   :  { %1192 = vmatpush.msra.mxu3 %v1693_v28 }
 0xbfc   :  { %v458_v30 = vpop.f32.mrf.mxu3 }
 0xbfd   :  { %v462_v32 = vrot.slane %v458_v30, 6 }
 0xbff   :  { %v464_v34 = vadd.f32 %v462_v32, %v1669_v60 }
 0xc01   :  { %1401 = vtanh.f32 %v464_v34  ;;  %v1314_v39 = vmul.f32 -1.442695, %v464_v34 }
 0xc04   :  { %v715_v4 = vpop.f32.mrf.mxu3 }
 0xc05   :  { %v718_v31 = vadd.f32 %v715_v4, %v1722_v36 }
 0xc07   :  { %v1402_v37 = vpop.eup %1401  ;;  %1403 = vtanh.f32 %v718_v31  ;;  %v1325_v40 = vmul.f32 -1.442695, %v718_v31 }
 0xc08   :  { %490 = vrot.lane.b32.xlu0 %v1402_v37, %s1545_s23  ;;  %1405 = vpow2.f32 %v1314_v39 }
 0xc09   :  { %1407 = vpow2.f32 %v1325_v40 }
 0xc0d   :  { %v1404_v38 = vpop.eup %1403 }
 0xc0e   :  { %741 = vrot.lane.b32.xlu1 %v1404_v38, %s1545_s23  ;;  %v1406_v41 = vpop.eup %1405 }
 0xc0f   :  { %v468_v42 = vadd.f32 1.0, %v1406_v41  ;;  %v1408_v43 = vpop.eup %1407 }
 0xc10   :  { %v722_v7 = vadd.f32 1.0, %v1408_v43 }
 0xc11   :  { %1409 = vrcp.f32 %v468_v42  ;;  %v480_v52 = vand.u32 2147483648, %v468_v42  ;;  %vm474_vm13 = vweird.f32 %v468_v42  ;;  %v478_v53 = vand.u32 2147483647, %v468_v42 }
 0xc12   :  { %1411 = vrcp.f32 %v722_v7  ;;  %v734_v61 = vand.u32 2147483648, %v722_v7  ;;  %vm728_vm4 = vweird.f32 %v722_v7  ;;  %v732_v63 = vand.u32 2147483647, %v722_v7 }
 0xc13   :  { %v481_v56 = vor.u32 1.1754944e-38, %v480_v52  ;;  %vm479_vm15 = vcmp.eq.f32.partialorder %v478_v53, 8.507059e+37 }
 0xc14   :  { %v735_v1 = vor.u32 1.1754944e-38, %v734_v61  ;;  %vm733_vm6 = vcmp.eq.f32.partialorder %v732_v63, 8.507059e+37 }
 0xc17   :  { %v1410_v44 = vpop.eup %1409 }
 0xc18   :  { %v470_v45 = vmul.f32 %v1410_v44, %v468_v42  ;;  %v1412_v46 = vpop.eup %1411  ;;  %vm475_vm12 = vweird.f32 %v1410_v44 }
 0xc19   :  { %v724_v48 = vmul.f32 %v1412_v46, %v722_v7  ;;  %vm476_vm14 = vmor %vm474_vm13, %vm475_vm12  ;;  %vm729_vm3 = vweird.f32 %v1412_v46 }
 0xc1a   :  { %v471_v47 = vsub.f32 1.0, %v470_v45  ;;  %vm730_vm5 = vmor %vm728_vm4, %vm729_vm3 }
 0xc1b   :  { %v725_v50 = vsub.f32 1.0, %v724_v48 }
 0xc1c   :  { %v472_v49 = vmul.f32 %v1410_v44, %v471_v47 }
 0xc1d   :  { %v726_v54 = vmul.f32 %v1412_v46, %v725_v50 }
 0xc1e   :  { %v473_v51 = vadd.f32 %v1410_v44, %v472_v49 }
 0xc1f   :  { %v727_v57 = vadd.f32 %v1412_v46, %v726_v54 }
 0xc20   :  { %v477_v55 = vsel %vm476_vm14, %v1410_v44, %v473_v51 }
 0xc21   :  { %v482_v59 = vsel %vm479_vm15, %v481_v56, %v477_v55  ;;  %v731_v0 = vsel %vm730_vm5, %v1412_v46, %v727_v57 }
 0xc22   :  { %v736_v3 = vsel %vm733_vm6, %v735_v1, %v731_v0  ;;  %v488_v9 = vmul.f32 %v486_v8, %v482_v59 }
 0xc23   :  { %v739_v12 = vmul.f32 0.0, %v736_v3 }
 0xc7a   :  { %v491_v58 = vpop.permute.xlu0 %490 }
 0xc7b   :  { %v493_v62 = vmul.f32 %v491_v58, %v482_v59 }
 0xc7d   :  { %495 = vrot.lane.b32.xlu2 %v493_v62, %s1546_s3 }
 0xc80   :  { %v742_v2 = vpop.permute.xlu1 %741 }
 0xc81   :  { %v744_v6 = vmul.f32 %v742_v2, %v736_v3 }
 0xc83   :  { %746 = vrot.lane.b32.xlu0 %v744_v6, %s1546_s3 }
 0xcd7   :  { %v496_v10 = vpop.permute.xlu2 %495 }
 0xcd8   :  { %v1730_v5 = vadd.f32 %v496_v10, %v488_v9 }
 0xcda   :  { %1413 = vtanh.f32 %v1730_v5  ;;  %v556_v1 = vrot.slane %v1730_v5, 6 }
 0xce0   :  { %v1414_v11 = vpop.eup %1413 }
 0xce1   :  { %501 = vrot.lane.b32.xlu1 %v1414_v11, %s1547_s24 }
 0xcf5   :  { %v747_v13 = vpop.permute.xlu0 %746 }
 0xcf6   :  { %v1734_v14 = vadd.f32 %v747_v13, %v739_v12 }
 0xcf8   :  { %1415 = vtanh.f32 %v1734_v14  ;;  %v806_v8 = vrot.slane %v1734_v14, 6 }
 0xcfe   :  { %v1416_v15 = vpop.eup %1415 }
 0xcff   :  { %752 = vrot.lane.b32.xlu2 %v1416_v15, %s1547_s24 }
 0xd53   :  { %v502_v16 = vpop.permute.xlu1 %501 }
 0xd54   :  { %v1738_v17 = vmul.f32 %v502_v16, %v482_v59 }
 0xd56   :  { %v506_v18 = vrot.slane %v1738_v17, 2  ;;  %v650_v16 = vsel %vm98_vm1, %v1687_v26, %v1738_v17 }
 0xd58   :  { %507 = vrot.lane.b32.xlu0 %v506_v18, %s1548_s25 }
 0xd59   :  { %v753_v19 = vpop.permute.xlu2 %752 }
 0xd5a   :  { %v755_v20 = vmul.f32 %v753_v19, %v736_v3 }
 0xd5c   :  { %757 = vrot.lane.b32.xlu1 %v755_v20, %s1548_s25 }
 0xdca   :  { %v508_v21 = vpop.permute.xlu0 %507 }
 0xdcb   :  { %1316 = vmatmul.msk.f32.vlgmr.msrb.gmra.mxu0 %vm94_vm7, %v508_v21 }
 0xdcc   :  { %1335 = vmatpush.msk.msrb.mxu0 %vm98_vm1, %v1691_v27 }
 0xdce   :  { %986 = vmatpush.msrb.mxu0 %v1693_v28  ;;  %v758_v22 = vpop.permute.xlu1 %757 }
 0xdd3   :  { %1327 = vmatmul.msk.f32.vlgmr.msra.gmra.mxu0 %vm94_vm7, %v758_v22 }
 0xe48   :  { %v528_v23 = vpop.f32.mrf.mxu0 }
 0xe49   :  { %v532_v24 = vrot.slane %v528_v23, 4 }
 0xe4b   :  { %v534_v25 = vadd.f32 %v532_v24, %v1669_v60 }
 0xe4d   :  { %1417 = vtanh.f32 %v534_v25  ;;  %v1317_v4 = vmul.f32 -1.442695, %v534_v25 }
 0xe50   :  { %v778_v29 = vpop.f32.mrf.mxu0 }
 0xe51   :  { %v782_v30 = vrot.slane %v778_v29, 6 }
 0xe53   :  { %v1418_v32 = vpop.eup %1417  ;;  %v784_v34 = vadd.f32 %v782_v30, %v1722_v36 }
 0xe54   :  { %560 = vrot.lane.b32.xlu2 %v1418_v32, %s1545_s23 }
 0xe55   :  { %1419 = vtanh.f32 %v784_v34  ;;  %v1328_v41 = vmul.f32 -1.442695, %v784_v34 }
 0xe56   :  { %1421 = vpow2.f32 %v1317_v4 }
 0xe5b   :  { %v1420_v35 = vpop.eup %1419 }
 0xe5c   :  { %810 = vrot.lane.b32.xlu0 %v1420_v35, %s1545_s23  ;;  %v1422_v31 = vpop.eup %1421 }
 0xe5d   :  { %v538_v37 = vadd.f32 1.0, %v1422_v31 }
 0xe5f   :  { %1423 = vrcp.f32 %v538_v37  ;;  %v550_v7 = vand.u32 2147483648, %v538_v37  ;;  %vm544_vm9 = vweird.f32 %v538_v37  ;;  %v548_v44 = vand.u32 2147483647, %v538_v37 }
 0xe60   :  { %1425 = vpow2.f32 %v1328_v41 }
 0xe61   :  { %v551_v47 = vor.u32 1.1754944e-38, %v550_v7  ;;  %vm549_vm11 = vcmp.eq.f32.partialorder %v548_v44, 8.507059e+37 }
 0xe65   :  { %v1424_v38 = vpop.eup %1423 }
 0xe66   :  { %v540_v39 = vmul.f32 %v1424_v38, %v538_v37  ;;  %vm545_vm2 = vweird.f32 %v1424_v38  ;;  %v1426_v45 = vpop.eup %1425 }
 0xe67   :  { %vm546_vm10 = vmor %vm544_vm9, %vm545_vm2  ;;  %v788_v48 = vadd.f32 1.0, %v1426_v45 }
 0xe68   :  { %v541_v40 = vsub.f32 1.0, %v540_v39 }
 0xe69   :  { %1427 = vrcp.f32 %v788_v48  ;;  %v800_v57 = vand.u32 2147483648, %v788_v48  ;;  %vm794_vm13 = vweird.f32 %v788_v48  ;;  %v798_v58 = vand.u32 2147483647, %v788_v48 }
 0xe6a   :  { %v542_v42 = vmul.f32 %v1424_v38, %v541_v40 }
 0xe6b   :  { %v801_v61 = vor.u32 1.1754944e-38, %v800_v57  ;;  %vm799_vm15 = vcmp.eq.f32.partialorder %v798_v58, 8.507059e+37 }
 0xe6c   :  { %v543_v43 = vadd.f32 %v1424_v38, %v542_v42 }
 0xe6e   :  { %v547_v46 = vsel %vm546_vm10, %v1424_v38, %v543_v43 }
 0xe6f   :  { %v552_v50 = vsel %vm549_vm11, %v551_v47, %v547_v46  ;;  %v1428_v52 = vpop.eup %1427 }
 0xe70   :  { %v790_v53 = vmul.f32 %v1428_v52, %v788_v48  ;;  %vm795_vm12 = vweird.f32 %v1428_v52  ;;  %v558_v2 = vmul.f32 %v556_v1, %v552_v50 }
 0xe71   :  { %vm796_vm14 = vmor %vm794_vm13, %vm795_vm12 }
 0xe72   :  { %v791_v54 = vsub.f32 1.0, %v790_v53 }
 0xe74   :  { %v792_v55 = vmul.f32 %v1428_v52, %v791_v54 }
 0xe76   :  { %v793_v56 = vadd.f32 %v1428_v52, %v792_v55 }
 0xe78   :  { %v797_v59 = vsel %vm796_vm14, %v1428_v52, %v793_v56 }
 0xe79   :  { %v802_v63 = vsel %vm799_vm15, %v801_v61, %v797_v59 }
 0xe7a   :  { %v808_v9 = vmul.f32 %v806_v8, %v802_v63 }
 0xeae   :  { %v561_v49 = vpop.permute.xlu2 %560 }
 0xeaf   :  { %v563_v51 = vmul.f32 %v561_v49, %v552_v50 }
 0xeb1   :  { %565 = vrot.lane.b32.xlu1 %v563_v51, %s1546_s3 }
 0xece   :  { %v811_v62 = vpop.permute.xlu0 %810 }
 0xecf   :  { %v813_v0 = vmul.f32 %v811_v62, %v802_v63 }
 0xed1   :  { %815 = vrot.lane.b32.xlu2 %v813_v0, %s1546_s3 }
 0xf23   :  { %v566_v3 = vpop.permute.xlu1 %565 }
 0xf24   :  { %v1755_v6 = vadd.f32 %v566_v3, %v558_v2 }
 0xf26   :  { %1429 = vtanh.f32 %v1755_v6 }
 0xf2b   :  { %v816_v10 = vpop.permute.xlu2 %815 }
 0xf2c   :  { %v1430_v11 = vpop.eup %1429  ;;  %v818_v12 = vadd.f32 %v816_v10, %v808_v9 }
 0xf2d   :  { %571 = vrot.lane.b32.xlu0 %v1430_v11, %s1547_s24 }
 0xf2e   :  { %1431 = vtanh.f32 %v818_v12  ;;  %v876_v46 = vrot.slane %v818_v12, 6 }
 0xf34   :  { %v1432_v13 = vpop.eup %1431 }
 0xf35   :  { %821 = vrot.lane.b32.xlu1 %v1432_v13, %s1547_s24  ;;  %v626_v13 = vrot.slane %v1755_v6, 6 }
 0xf9f   :  { %v572_v15 = vpop.permute.xlu0 %571 }
 0xfa0   :  { %v574_v5 = vmul.f32 %v572_v15, %v552_v50 }
 0xfa2   :  { %v576_v18 = vrot.slane %v574_v5, 4  ;;  %v1765_v19 = vsel %vm646_vm0, %v650_v16, %v574_v5 }
 0xfa4   :  { %577 = vrot.lane.b32.xlu2 %v576_v18, %s1548_s25 }
 0xfa7   :  { %v822_v14 = vpop.permute.xlu1 %821 }
 0xfa8   :  { %v824_v20 = vmul.f32 %v822_v14, %v802_v63 }
 0xfaa   :  { %v826_v21 = vrot.slane %v824_v20, 2 }
 0xfac   :  { %827 = vrot.lane.b32.xlu0 %v826_v21, %s1548_s25 }
 0xffe   :  { %v578_v22 = vpop.permute.xlu2 %577 }
 0xfff   :  { %1319 = vmatmul.msk.f32.vlgmr.msra.gmra.mxu1 %vm94_vm7, %v578_v22 }
0x1000   :  { %1338 = vmatpush.msk.msra.mxu1 %vm98_vm1, %v1691_v27 }
0x1002   :  { %1052 = vmatpush.msra.mxu1 %v1693_v28 }
0x101e   :  { %v828_v26 = vpop.permute.xlu0 %827 }
0x101f   :  { %1330 = vmatmul.msk.f32.vlgmr.msrb.gmra.mxu1 %vm94_vm7, %v828_v26 }
0x107c   :  { %v598_v17 = vpop.f32.mrf.mxu1 }
0x107d   :  { %v602_v39 = vrot.slane %v598_v17, 2 }
0x107f   :  { %v604_v42 = vadd.f32 %v602_v39, %v1669_v60 }
0x1081   :  { %v1320_v60 = vmul.f32 -1.442695, %v604_v42 }
0x109c   :  { %v848_v23 = vpop.f32.mrf.mxu1 }
0x109d   :  { %v852_v24 = vrot.slane %v848_v23, 4 }
0x109f   :  { %v854_v25 = vadd.f32 %v852_v24, %v1722_v36 }
0x10a1   :  { %1433 = vtanh.f32 %v854_v25  ;;  %v1331_v30 = vmul.f32 -1.442695, %v854_v25 }
0x10a3   :  { %1435 = vpow2.f32 %v1331_v30 }
0x10a7   :  { %v1434_v29 = vpop.eup %1433 }
0x10a8   :  { %880 = vrot.lane.b32.xlu1 %v1434_v29, %s1545_s23 }
0x10a9   :  { %v1436_v32 = vpop.eup %1435 }
0x10aa   :  { %v858_v34 = vadd.f32 1.0, %v1436_v32 }
0x10ac   :  { %1437 = vrcp.f32 %v858_v34  ;;  %v870_v37 = vand.u32 2147483648, %v858_v34  ;;  %vm864_vm3 = vweird.f32 %v858_v34  ;;  %v868_v38 = vand.u32 2147483647, %v858_v34 }
0x10ad   :  { %1439 = vtanh.f32 %v604_v42 }
0x10ae   :  { %v871_v41 = vor.u32 1.1754944e-38, %v870_v37  ;;  %vm869_vm5 = vcmp.eq.f32.partialorder %v868_v38, 8.507059e+37 }
0x10b2   :  { %v1438_v27 = vpop.eup %1437 }
0x10b3   :  { %v860_v35 = vmul.f32 %v1438_v27, %v858_v34  ;;  %vm865_vm0 = vweird.f32 %v1438_v27  ;;  %v1440_v45 = vpop.eup %1439 }
0x10b4   :  { %vm866_vm4 = vmor %vm864_vm3, %vm865_vm0 }
0x10b5   :  { %v861_v28 = vsub.f32 1.0, %v860_v35 }
0x10b7   :  { %v862_v4 = vmul.f32 %v1438_v27, %v861_v28 }
0x10b9   :  { %v863_v31 = vadd.f32 %v1438_v27, %v862_v4 }
0x10bb   :  { %v867_v40 = vsel %vm866_vm4, %v1438_v27, %v863_v31 }
0x10bc   :  { %v872_v7 = vsel %vm869_vm5, %v871_v41, %v867_v40 }
0x10bd   :  { %v878_v47 = vmul.f32 %v876_v46, %v872_v7 }
0x111a   :  { %v881_v43 = vpop.permute.xlu1 %880 }
0x111b   :  { %v883_v44 = vmul.f32 %v881_v43, %v872_v7 }
0x111d   :  { %885 = vrot.lane.b32.xlu2 %v883_v44, %s1546_s3 }
0x1125   :  { %630 = vrot.lane.b32.xlu2 %v1440_v45, %s1545_s23 }
0x1177   :  { %v886_v48 = vpop.permute.xlu2 %885 }
0x1178   :  { %v1779_v49 = vadd.f32 %v886_v48, %v878_v47 }
0x117a   :  { %1441 = vtanh.f32 %v1779_v49  ;;  %v946_v31 = vrot.slane %v1779_v49, 6 }
0x117b   :  { %1443 = vpow2.f32 %v1320_v60 }
0x117f   :  { %v631_v2 = vpop.permute.xlu2 %630 }
0x1180   :  { %v1442_v50 = vpop.eup %1441 }
0x1181   :  { %891 = vrot.lane.b32.xlu0 %v1442_v50, %s1547_s24  ;;  %v1444_v51 = vpop.eup %1443 }
0x1182   :  { %v608_v52 = vadd.f32 1.0, %v1444_v51 }
0x1184   :  { %1445 = vrcp.f32 %v608_v52  ;;  %v620_v62 = vand.u32 2147483648, %v608_v52  ;;  %vm614_vm2 = vweird.f32 %v608_v52  ;;  %v618_v63 = vand.u32 2147483647, %v608_v52 }
0x1186   :  { %v621_v1 = vor.u32 1.1754944e-38, %v620_v62  ;;  %vm619_vm10 = vcmp.eq.f32.partialorder %v618_v63, 8.507059e+37 }
0x118a   :  { %v1446_v53 = vpop.eup %1445 }
0x118b   :  { %v610_v54 = vmul.f32 %v1446_v53, %v608_v52  ;;  %vm615_vm6 = vweird.f32 %v1446_v53 }
0x118c   :  { %vm616_vm9 = vmor %vm614_vm2, %vm615_vm6 }
0x118d   :  { %v611_v55 = vsub.f32 1.0, %v610_v54 }
0x118f   :  { %v612_v56 = vmul.f32 %v1446_v53, %v611_v55 }
0x1191   :  { %v613_v59 = vadd.f32 %v1446_v53, %v612_v56 }
0x1193   :  { %v617_v0 = vsel %vm616_vm9, %v1446_v53, %v613_v59 }
0x1194   :  { %v622_v3 = vsel %vm619_vm10, %v621_v1, %v617_v0 }
0x1195   :  { %v633_v8 = vmul.f32 %v631_v2, %v622_v3  ;;  %v628_v5 = vmul.f32 %v626_v13, %v622_v3 }
0x11f3   :  { %v892_v57 = vpop.permute.xlu0 %891 }
0x11f4   :  { %v894_v58 = vmul.f32 %v892_v57, %v872_v7 }
0x11f6   :  { %v896_v61 = vrot.slane %v894_v58, 4 }
0x11f8   :  { %897 = vrot.lane.b32.xlu1 %v896_v61, %s1548_s25 }
0x1200   :  { %635 = vrot.lane.b32.xlu1 %v633_v8, %s1546_s3 }
0x126a   :  { %v898_v9 = vpop.permute.xlu1 %897 }
0x126b   :  { %1333 = vmatmul.msk.f32.vlgmr.msrb.gmra.mxu3 %vm94_vm7, %v898_v9 }
0x1272   :  { %v636_v15 = vpop.permute.xlu1 %635 }
0x1273   :  { %v638_v16 = vadd.f32 %v636_v15, %v628_v5 }
0x12ee   :  { %v918_v10 = vpop.f32.mrf.mxu3 }
0x12ef   :  { %v922_v11 = vrot.slane %v918_v10, 2 }
0x12f1   :  { %v924_v12 = vadd.f32 %v922_v11, %v1722_v36 }
0x12f3   :  { %1447 = vtanh.f32 %v924_v12  ;;  %v1334_v20 = vmul.f32 -1.442695, %v924_v12 }
0x12f4   :  { %1449 = vtanh.f32 %v638_v16 }
0x12f5   :  { %1451 = vpow2.f32 %v1334_v20 }
0x12f9   :  { %v1448_v18 = vpop.eup %1447 }
0x12fa   :  { %950 = vrot.lane.b32.xlu0 %v1448_v18, %s1545_s23  ;;  %v1450_v14 = vpop.eup %1449 }
0x12fb   :  { %v1452_v21 = vpop.eup %1451 }
0x12fc   :  { %v928_v22 = vadd.f32 1.0, %v1452_v21 }
0x12fe   :  { %1453 = vrcp.f32 %v928_v22  ;;  %v940_v24 = vand.u32 2147483648, %v928_v22  ;;  %vm934_vm12 = vweird.f32 %v928_v22  ;;  %v938_v25 = vand.u32 2147483647, %v928_v22 }
0x1300   :  { %v941_v30 = vor.u32 1.1754944e-38, %v940_v24  ;;  %vm939_vm14 = vcmp.eq.f32.partialorder %v938_v25, 8.507059e+37 }
0x1302   :  { %641 = vrot.lane.b32.xlu0 %v1450_v14, %s1547_s24 }
0x1304   :  { %v1454_v26 = vpop.eup %1453 }
0x1305   :  { %v930_v36 = vmul.f32 %v1454_v26, %v928_v22  ;;  %vm935_vm11 = vweird.f32 %v1454_v26 }
0x1306   :  { %vm936_vm13 = vmor %vm934_vm12, %vm935_vm11 }
0x1307   :  { %v931_v17 = vsub.f32 1.0, %v930_v36 }
0x1309   :  { %v932_v6 = vmul.f32 %v1454_v26, %v931_v17 }
0x130b   :  { %v933_v23 = vadd.f32 %v1454_v26, %v932_v6 }
0x130d   :  { %v937_v29 = vsel %vm936_vm13, %v1454_v26, %v933_v23 }
0x130e   :  { %v942_v34 = vsel %vm939_vm14, %v941_v30, %v937_v29 }
0x130f   :  { %v948_v37 = vmul.f32 %v946_v31, %v942_v34 }
0x136c   :  { %v951_v32 = vpop.permute.xlu0 %950 }
0x136d   :  { %v953_v27 = vmul.f32 %v951_v32, %v942_v34 }
0x136f   :  { %955 = vrot.lane.b32.xlu2 %v953_v27, %s1546_s3 }
0x1374   :  { %v642_v35 = vpop.permute.xlu0 %641 }
0x1375   :  { %v644_v28 = vmul.f32 %v642_v35, %v622_v3 }
0x1377   :  { %v652_v4 = vsel %vm648_vm8, %v1765_v19, %v644_v28 }
0x1378   :  { %663 = vrot.lane.b32.xlu2 %v652_v4, %s1548_s25 }
0x13c9   :  { %v956_v38 = vpop.permute.xlu2 %955 }
0x13ca   :  { %v958_v39 = vadd.f32 %v956_v38, %v948_v37 }
0x13cc   :  { %1455 = vtanh.f32 %v958_v39  ;;  %v1013_v63 = vrot.slane %v958_v39, 6 }
0x13d2   :  { %v1456_v40 = vpop.eup %1455  ;;  %v664_v41 = vpop.permute.xlu2 %663 }
0x13d3   :  { %961 = vrot.lane.b32.xlu1 %v1456_v40, %s1547_s24  ;;  %1323 = vmatmul.msk.f32.gmra.mxu2 %vm94_vm7, %v664_v41 }
0x1445   :  { %v962_v42 = vpop.permute.xlu1 %961 }
0x1446   :  { %v964_v43 = vmul.f32 %v962_v42, %v942_v34 }
0x1448   :  { %v966_v7 = vrot.slane %v964_v43, 6 }
0x144a   :  { %967 = vrot.lane.b32.xlu0 %v966_v7, %s1548_s25 }
0x1456   :  { %v692_v44 = vpop.f32.mrf.mxu2 }
0x1457   :  { %v1800_v45 = vadd.f32 %v1718_v33, %v692_v44 }
0x14bc   :  { %v968_v19 = vpop.permute.xlu0 %967 }
0x14bd   :  { %1336 = vmatmul.msk.f32.vlgmr.msrb.gmra.mxu0 %vm94_vm7, %v968_v19 }
0x153a   :  { %v988_v46 = vpop.f32.mrf.mxu0 }
0x153b   :  { %v991_v47 = vadd.f32 %v988_v46, %v1800_v45 }
0x153d   :  { %1457 = vtanh.f32 %v991_v47  ;;  %v1337_v49 = vmul.f32 -1.442695, %v991_v47 }
0x153f   :  { %1459 = vpow2.f32 %v1337_v49 }
0x1543   :  { %v1458_v48 = vpop.eup %1457 }
0x1544   :  { %1017 = vrot.lane.b32.xlu1 %v1458_v48, %s1545_s23 }
0x1545   :  { %v1460_v50 = vpop.eup %1459 }
0x1546   :  { %v995_v60 = vadd.f32 1.0, %v1460_v50 }
0x1548   :  { %1461 = vrcp.f32 %v995_v60  ;;  %v1007_v33 = vand.u32 2147483648, %v995_v60  ;;  %vm1001_vm15 = vweird.f32 %v995_v60  ;;  %v1005_v56 = vand.u32 2147483647, %v995_v60 }
0x154a   :  { %v1008_v58 = vor.u32 1.1754944e-38, %v1007_v33  ;;  %vm1006_vm3 = vcmp.eq.f32.partialorder %v1005_v56, 8.507059e+37 }
0x154e   :  { %v1462_v51 = vpop.eup %1461 }
0x154f   :  { %v997_v52 = vmul.f32 %v1462_v51, %v995_v60  ;;  %vm1002_vm8 = vweird.f32 %v1462_v51 }
0x1550   :  { %vm1003_vm0 = vmor %vm1001_vm15, %vm1002_vm8 }
0x1551   :  { %v998_v53 = vsub.f32 1.0, %v997_v52 }
0x1553   :  { %v999_v54 = vmul.f32 %v1462_v51, %v998_v53 }
0x1555   :  { %v1000_v55 = vadd.f32 %v1462_v51, %v999_v54 }
0x1557   :  { %v1004_v57 = vsel %vm1003_vm0, %v1462_v51, %v1000_v55 }
0x1558   :  { %v1009_v61 = vsel %vm1006_vm3, %v1008_v58, %v1004_v57 }
0x1559   :  { %v1015_v0 = vmul.f32 %v1013_v63, %v1009_v61 }
0x15b6   :  { %v1018_v59 = vpop.permute.xlu1 %1017 }
0x15b7   :  { %v1020_v62 = vmul.f32 %v1018_v59, %v1009_v61 }
0x15b9   :  { %1022 = vrot.lane.b32.xlu2 %v1020_v62, %s1546_s3 }
0x1613   :  { %v1023_v1 = vpop.permute.xlu2 %1022 }
0x1614   :  { %v1025_v2 = vadd.f32 %v1023_v1, %v1015_v0 }
0x1616   :  { %1463 = vtanh.f32 %v1025_v2  ;;  %v1082_v30 = vrot.slane %v1025_v2, 6 }
0x161c   :  { %v1464_v3 = vpop.eup %1463 }
0x161d   :  { %1028 = vrot.lane.b32.xlu0 %v1464_v3, %s1547_s24 }
0x168f   :  { %v1029_v8 = vpop.permute.xlu0 %1028 }
0x1690   :  { %v1031_v9 = vmul.f32 %v1029_v8, %v1009_v61 }
0x1692   :  { %1033 = vrot.lane.b32.xlu1 %v1031_v9, %s1548_s25 }
0x1704   :  { %v1034_v10 = vpop.permute.xlu1 %1033 }
0x1705   :  { %1339 = vmatmul.msk.f32.vlgmr.msra.gmra.mxu1 %vm94_vm7, %v1034_v10 }
0x1782   :  { %v1054_v11 = vpop.f32.mrf.mxu1 }
0x1783   :  { %v1058_v12 = vrot.slane %v1054_v11, 6 }
0x1785   :  { %v1060_v13 = vadd.f32 %v1058_v12, %v1800_v45 }
0x1787   :  { %1465 = vtanh.f32 %v1060_v13  ;;  %v1340_v5 = vmul.f32 -1.442695, %v1060_v13 }
0x1789   :  { %1467 = vpow2.f32 %v1340_v5 }
0x178d   :  { %v1466_v15 = vpop.eup %1465 }
0x178e   :  { %1086 = vrot.lane.b32.xlu2 %v1466_v15, %s1545_s23 }
0x178f   :  { %v1468_v16 = vpop.eup %1467 }
0x1790   :  { %v1064_v18 = vadd.f32 1.0, %v1468_v16 }
0x1792   :  { %1469 = vrcp.f32 %v1064_v18  ;;  %v1076_v36 = vand.u32 2147483648, %v1064_v18  ;;  %vm1070_vm5 = vweird.f32 %v1064_v18  ;;  %v1074_v17 = vand.u32 2147483647, %v1064_v18 }
0x1794   :  { %v1077_v23 = vor.u32 1.1754944e-38, %v1076_v36  ;;  %vm1075_vm2 = vcmp.eq.f32.partialorder %v1074_v17, 8.507059e+37 }
0x1798   :  { %v1470_v14 = vpop.eup %1469 }
0x1799   :  { %v1066_v20 = vmul.f32 %v1470_v14, %v1064_v18  ;;  %vm1071_vm4 = vweird.f32 %v1470_v14 }
0x179a   :  { %vm1072_vm6 = vmor %vm1070_vm5, %vm1071_vm4 }
0x179b   :  { %v1067_v21 = vsub.f32 1.0, %v1066_v20 }
0x179d   :  { %v1068_v22 = vmul.f32 %v1470_v14, %v1067_v21 }
0x179f   :  { %v1069_v26 = vadd.f32 %v1470_v14, %v1068_v22 }
0x17a1   :  { %v1073_v6 = vsel %vm1072_vm6, %v1470_v14, %v1069_v26 }
0x17a2   :  { %v1078_v25 = vsel %vm1075_vm2, %v1077_v23, %v1073_v6 }
0x17a3   :  { %v1084_v32 = vmul.f32 %v1082_v30, %v1078_v25 }
0x17e8   :  { %v1087_v24 = vpop.permute.xlu2 %1086 }
0x17e9   :  { %v1089_v29 = vmul.f32 %v1087_v24, %v1078_v25  ;;  %v1242_v24 = vld [vmem:[%s1846_s7 + $0x8] sm:$0x3] }
0x17ea   :  { %1347 = vmatpush.msk.msra.mxu0 %vm98_vm1, %v1242_v24  ;;  %vm1276_vm1 = vcmask 17408  }
0x17eb   :  { %1091 = vrot.lane.b32.xlu0 %v1089_v29, %s1546_s3 }
0x185d   :  { %v1092_v34 = vpop.permute.xlu0 %1091 }
0x185e   :  { %v1094_v27 = vadd.f32 %v1092_v34, %v1084_v32 }
0x1860   :  { %1471 = vtanh.f32 %v1094_v27  ;;  %v1152_v55 = vrot.slane %v1094_v27, 6  ;;  %v1360_v27 = vld [vmem:[%s1847_s8] ss:$0 sm:$0xff] }
0x1866   :  { %v1472_v35 = vpop.eup %1471 }
0x1867   :  { %1097 = vrot.lane.b32.xlu1 %v1472_v35, %s1547_s24 }
0x18d9   :  { %v1098_v28 = vpop.permute.xlu1 %1097 }
0x18da   :  { %v1100_v4 = vmul.f32 %v1098_v28, %v1078_v25  ;;  %v1241_v25 = vld [vmem:[%s1846_s7] sm:$0xff]  ;;  %s1285_s7 = sshll.u32 %s1848_s9, 4  ;;  %s1286_s7 = int_to_ptr.hbm [resolvable:$true] %s1285_s7 }
0x18db   :  { %1271 = vmatpush.msra.mxu0 %v1241_v25 }
0x18dc   :  { %v1102_v31 = vrot.slane %v1100_v4, 2 }
0x18de   :  { %1103 = vrot.lane.b32.xlu2 %v1102_v31, %s1548_s25 }
0x1938   :  { %v1104_v37 = vpop.permute.xlu2 %1103 }
0x1939   :  { %1342 = vmatmul.msk.f32.vlgmr.msrb.gmra.mxu2 %vm94_vm7, %v1104_v37 }
0x19bc   :  { %v1124_v38 = vpop.f32.mrf.mxu2 }
0x19bd   :  { %v1128_v39 = vrot.slane %v1124_v38, 4 }
0x19bf   :  { %v1130_v40 = vadd.f32 %v1128_v39, %v1800_v45 }
0x19c1   :  { %1473 = vtanh.f32 %v1130_v40  ;;  %v1343_v42 = vmul.f32 -1.442695, %v1130_v40 }
0x19c3   :  { %1475 = vpow2.f32 %v1343_v42 }
0x19c7   :  { %v1474_v41 = vpop.eup %1473 }
0x19c8   :  { %1156 = vrot.lane.b32.xlu0 %v1474_v41, %s1545_s23 }
0x19c9   :  { %v1476_v43 = vpop.eup %1475 }
0x19ca   :  { %v1134_v7 = vadd.f32 1.0, %v1476_v43 }
0x19cc   :  { %1477 = vrcp.f32 %v1134_v7  ;;  %v1146_v49 = vand.u32 2147483648, %v1134_v7  ;;  %vm1140_vm10 = vweird.f32 %v1134_v7  ;;  %v1144_v50 = vand.u32 2147483647, %v1134_v7 }
0x19ce   :  { %v1147_v51 = vor.u32 1.1754944e-38, %v1146_v49  ;;  %vm1145_vm12 = vcmp.eq.f32.partialorder %v1144_v50, 8.507059e+37 }
0x19d2   :  { %v1478_v19 = vpop.eup %1477 }
0x19d3   :  { %v1136_v44 = vmul.f32 %v1478_v19, %v1134_v7  ;;  %vm1141_vm9 = vweird.f32 %v1478_v19 }
0x19d4   :  { %vm1142_vm11 = vmor %vm1140_vm10, %vm1141_vm9 }
0x19d5   :  { %v1137_v46 = vsub.f32 1.0, %v1136_v44 }
0x19d7   :  { %v1138_v47 = vmul.f32 %v1478_v19, %v1137_v46 }
0x19d9   :  { %v1139_v48 = vadd.f32 %v1478_v19, %v1138_v47 }
0x19db   :  { %v1143_v60 = vsel %vm1142_vm11, %v1478_v19, %v1139_v48 }
0x19dc   :  { %v1148_v53 = vsel %vm1145_vm12, %v1147_v51, %v1143_v60 }
0x19dd   :  { %v1154_v33 = vmul.f32 %v1152_v55, %v1148_v53 }
0x1a3a   :  { %v1157_v52 = vpop.permute.xlu0 %1156 }
0x1a3b   :  { %v1159_v54 = vmul.f32 %v1157_v52, %v1148_v53 }
0x1a3d   :  { %1161 = vrot.lane.b32.xlu1 %v1159_v54, %s1546_s3 }
0x1aaf   :  { %v1162_v56 = vpop.permute.xlu1 %1161 }
0x1ab0   :  { %v1164_v57 = vadd.f32 %v1162_v56, %v1154_v33 }
0x1ab2   :  { %1479 = vtanh.f32 %v1164_v57  ;;  %v1222_v26 = vrot.slane %v1164_v57, 6 }
0x1ab8   :  { %v1480_v58 = vpop.eup %1479 }
0x1ab9   :  { %1167 = vrot.lane.b32.xlu2 %v1480_v58, %s1547_s24 }
0x1b13   :  { %v1168_v59 = vpop.permute.xlu2 %1167 }
0x1b14   :  { %v1170_v61 = vmul.f32 %v1168_v59, %v1148_v53 }
0x1b16   :  { %v1172_v62 = vrot.slane %v1170_v61, 4 }
0x1b18   :  { %1173 = vrot.lane.b32.xlu0 %v1172_v62, %s1548_s25 }
0x1b8a   :  { %v1174_v63 = vpop.permute.xlu0 %1173 }
0x1b8b   :  { %1345 = vmatmul.msk.f32.vlgmr.msra.gmra.mxu3 %vm94_vm7, %v1174_v63 }
0x1c0e   :  { %v1194_v0 = vpop.f32.mrf.mxu3 }
0x1c0f   :  { %v1198_v1 = vrot.slane %v1194_v0, 2 }
0x1c11   :  { %v1200_v2 = vadd.f32 %v1198_v1, %v1800_v45 }
0x1c13   :  { %1481 = vtanh.f32 %v1200_v2  ;;  %v1346_v8 = vmul.f32 -1.442695, %v1200_v2 }
0x1c15   :  { %1483 = vpow2.f32 %v1346_v8 }
0x1c19   :  { %v1482_v3 = vpop.eup %1481 }
0x1c1a   :  { %1226 = vrot.lane.b32.xlu1 %v1482_v3, %s1545_s23 }
0x1c1b   :  { %v1484_v9 = vpop.eup %1483 }
0x1c1c   :  { %v1204_v10 = vadd.f32 1.0, %v1484_v9 }
0x1c1e   :  { %1485 = vrcp.f32 %v1204_v10  ;;  %v1216_v16 = vand.u32 2147483648, %v1204_v10  ;;  %vm1210_vm14 = vweird.f32 %v1204_v10  ;;  %v1214_v18 = vand.u32 2147483647, %v1204_v10 }
0x1c20   :  { %v1217_v14 = vor.u32 1.1754944e-38, %v1216_v16  ;;  %vm1215_vm15 = vcmp.eq.f32.partialorder %v1214_v18, 8.507059e+37 }
0x1c24   :  { %v1486_v11 = vpop.eup %1485 }
0x1c25   :  { %v1206_v12 = vmul.f32 %v1486_v11, %v1204_v10  ;;  %vm1211_vm13 = vweird.f32 %v1486_v11 }
0x1c26   :  { %vm1212_vm8 = vmor %vm1210_vm14, %vm1211_vm13 }
0x1c27   :  { %v1207_v13 = vsub.f32 1.0, %v1206_v12 }
0x1c29   :  { %v1208_v15 = vmul.f32 %v1486_v11, %v1207_v13 }
0x1c2b   :  { %v1209_v5 = vadd.f32 %v1486_v11, %v1208_v15 }
0x1c2d   :  { %v1213_v45 = vsel %vm1212_vm8, %v1486_v11, %v1209_v5 }
0x1c2e   :  { %v1218_v21 = vsel %vm1215_vm15, %v1217_v14, %v1213_v45 }
0x1c2f   :  { %v1224_v36 = vmul.f32 %v1222_v26, %v1218_v21 }
0x1c8c   :  { %v1227_v20 = vpop.permute.xlu1 %1226 }
0x1c8d   :  { %v1229_v22 = vmul.f32 %v1227_v20, %v1218_v21 }
0x1c8f   :  { %1231 = vrot.lane.b32.xlu2 %v1229_v22, %s1546_s3 }
0x1ce9   :  { %v1232_v17 = vpop.permute.xlu2 %1231 }
0x1cea   :  { %v1234_v6 = vadd.f32 %v1232_v17, %v1224_v36 }
0x1cec   :  { %1487 = vtanh.f32 %v1234_v6 }
0x1cf2   :  { %v1488_v23 = vpop.eup %1487 }
0x1cf3   :  { %1237 = vrot.lane.b32.xlu0 %v1488_v23, %s1547_s24 }
0x1d65   :  { %v1238_v29 = vpop.permute.xlu0 %1237 }
0x1d66   :  { %v1240_v30 = vmul.f32 %v1238_v29, %v1218_v21 }
0x1d68   :  { %v1248_v32 = vrot.slane %v1240_v30, 6 }
0x1d6a   :  { %1249 = vrot.lane.b32.xlu1 %v1248_v32, %s1548_s25 }
0x1ddc   :  { %v1250_v34 = vpop.permute.xlu1 %1249 }
0x1ddd   :  { %1348 = vmatmul.msk.f32.vlgmr.msra.gmra.mxu0 %vm94_vm7, %v1250_v34 }
0x1e5a   :  { %v1273_v35 = vpop.f32.mrf.mxu0 }
0x1e5b   :  { %v1274_v28 = vadd.f32 %v1360_v27, %v1273_v35 }
0x1e5d   :  { %1277 = vst.msk [vmem:[#allocation5] sm:$0x3] %vm1276_vm1, %v1274_v28 }
0x1e5e   :  { %1288 = dma.vmem_to_hbm [thread:$0]  %s1284_s17, 32, %s1286_s7, [#allocation4]  }
0x1e5f   :  { %1539 = dma.done.wait [#allocation4], 32  }
0x1e60   :  { %1540 = vsyncadd [#allocation4], 4294967264 }
0x1e61   :  { %1293 = vsyncpa [#allocation3], 1 }
0x1e62   :  { %1294 = vsyncpa [#allocation4], 1 }

</bundles_post_ra>
